<compile_context>
chip_gen: v7x
topology: tpu7x:2x2x1
jax: 0.10.0
libtpu: 0.0.40
codegen_flags: <defaults>
</compile_context>

<pallas_src>
import functools

import jax
import jax.numpy as jnp
from jax.experimental import pallas as pl
from jax.experimental.pallas import tpu as pltpu


def _round_up(x, m):
    return ((x + m - 1) // m) * m


def _cdiv(a, b):
    return -(-a // b)


def _tensorcores_per_chip():
    """Best-effort TensorCores-per-chip query (2 on v7x, 1 on v5e/v6e).
    Falls back to 1 (single grid step) if unavailable; clamped to [1, 2] so a
    surprising attribute can never explode the grid into many tiny steps."""
    try:
        info = pltpu.get_tpu_info()
    except Exception:
        return 1
    for attr in ("tensorcores_per_chip", "num_tensorcores",
                 "cores_per_chip", "num_cores"):
        v = getattr(info, attr, None)
        if isinstance(v, int) and v > 0:
            return max(1, min(2, v))
    return 1


def _choose_tiling(B, in_cols, out_cols, n_cores, vmem_budget_bytes=12 << 20):
    """Collapse the grid to as few steps as possible.

    Per-step fixed cost (~600 cycles of DMA setup / pipeline bookkeeping)
    dominates the ~48 vmatmul pushes of real work per tile at small batch, so:
    one step on 1-TC chips, one step per TensorCore on v7x, and only split
    further when a whole-batch tile would not fit a conservative VMEM budget.
    Returns (batch_tile, padded_batch)."""
    bytes_per_row = 2 * 4 * (in_cols + out_cols)   # double-buffered f32 streams
    max_rows = max(8, (vmem_budget_bytes // bytes_per_row) // 8 * 8)
    n_steps = max(1, n_cores)
    while True:
        tb = _round_up(_cdiv(B, n_steps), 8)
        if tb <= max_rows or tb <= 8:
            return tb, tb * n_steps
        n_steps *= 2


# ------------------------------ kernel ------------------------------------
# aux row layout (lane-prefix packed, padded to w_aux lanes):
#   row 0: b_e0[:n0]   row 1: b_e1[:n1]   row 2: b_d0[:n1]   row 3: b_d1[:n0]
#   row 4: std[:d]  (= exp(0.5*log_var_param), precomputed outside the kernel)
#   row 5: slab bias = [b_mean | b_out | b_lvn | 0...]   (width = slab)
# weight slab row layout (static, sublane-aligned offsets o_*):
#   [o_e0: We0 (p,n0)] [o_e1: We1 (n0,n1)] [o_m: Wmean_wide (n1,slab)]
#   [o_d0: Wd0 (d,n1)] [o_d1: Wd1 (n1,n0)] [o_h: Whead_wide (n0,slab)]
def _gpvae_kernel(p, d, n0, n1, slab, offs, xe_ref, aux_ref, w_ref, slab_ref):
    o_e0, o_e1, o_m, o_d0, o_d1, o_h = offs
    wt = w_ref.dtype          # f32 (exact) or bf16 (full-rate MXU v6e/v7x)
    f32 = jnp.float32

    # ---- encoder MLP (Linear + ReLU) x2 ----
    x = xe_ref[:, :p].astype(wt)
    h = jnp.dot(x, w_ref[o_e0:o_e0 + p, :n0], preferred_element_type=f32)
    h = jnp.maximum(h + aux_ref[0:1, :n0], 0.0)
    h = jnp.dot(h.astype(wt), w_ref[o_e1:o_e1 + n0, :n1],
                preferred_element_type=f32)
    h = jnp.maximum(h + aux_ref[1:2, :n1], 0.0)

    # ---- mean head, staged directly through the resident output block ----
    # Wmean_wide has w_mean in columns [0:d], zeros elsewhere; the slab bias
    # row carries b_mean | b_out | b_lvn.  Writing to slab_ref here frees the
    # (tb, slab) accumulator registers across the decoder.
    slab_ref[...] = (jnp.dot(h.astype(wt), w_ref[o_m:o_m + n1, :slab],
                             preferred_element_type=f32)
                     + aux_ref[5:6, :slab])

    # ---- reparametrization: z = mean + eps * std  (std precomputed) ----
    z = slab_ref[:, :d] + xe_ref[:, p:p + d] * aux_ref[4:5, :d]

    # ---- decoder MLP (Linear + ReLU) x2 ----
    hd = jnp.dot(z.astype(wt), w_ref[o_d0:o_d0 + d, :n1],
                 preferred_element_type=f32)
    hd = jnp.maximum(hd + aux_ref[2:3, :n1], 0.0)
    hd = jnp.dot(hd.astype(wt), w_ref[o_d1:o_d1 + n1, :n0],
                 preferred_element_type=f32)
    hd = jnp.maximum(hd + aux_ref[3:4, :n0], 0.0)

    # ---- fused output heads accumulate into the lane-dense slab ----
    # Whead_wide columns [d:d+2p] hold [w_out | w_lvn] and are zero elsewhere,
    # so the final slab is [mean | x_mu | log_var_n | 0...] and every store is
    # an unmasked full-width vst.
    slab_ref[...] += jnp.dot(hd.astype(wt), w_ref[o_h:o_h + n0, :slab],
                             preferred_element_type=f32)


# ------------------------------ packing -----------------------------------
def pack_params(params, p, d, n0, n1, *, matmul_dtype=jnp.float32):
    """One-time repacking of the torch-style parameters into the kernel's
    consolidated layout (done in XLA outside the hot path).

    NOTE: the zero padding of unused weight/bias columns is a correctness
    invariant -- it is what makes the fused output slab equal
    [mean | x_mu | log_var_n | 0]."""
    slab = _round_up(d + 2 * p, 128)          # [mean | x_mu | lvn | 0-pad]
    in_cols = _round_up(p + d, 128)           # [x | eps | 0-pad]
    w_aux = _round_up(max(n0, n1, d, slab), 128)
    w_cols = max(_round_up(n0, 128), _round_up(n1, 128), slab)
    assert d + 2 * p <= slab and p + d <= in_cols and slab <= w_cols

    rup8 = lambda v: _round_up(v, 8)
    o_e0 = 0
    o_e1 = o_e0 + rup8(p)
    o_m = o_e1 + rup8(n0)
    o_d0 = o_m + rup8(n1)
    o_d1 = o_d0 + rup8(d)
    o_h = o_d1 + rup8(n1)
    w_rows = rup8(o_h + n0)

    w = jnp.zeros((w_rows, w_cols), jnp.float32)
    w = w.at[o_e0:o_e0 + p, :n0].set(params["w_e0"])
    w = w.at[o_e1:o_e1 + n0, :n1].set(params["w_e1"])
    w = w.at[o_m:o_m + n1, :d].set(params["w_mean"])
    w = w.at[o_d0:o_d0 + d, :n1].set(params["w_d0"])
    w = w.at[o_d1:o_d1 + n1, :n0].set(params["w_d1"])
    w = w.at[o_h:o_h + n0, d:d + p].set(params["w_out"])
    w = w.at[o_h:o_h + n0, d + p:d + 2 * p].set(params["w_lvn"])
    # bf16 weights (with f32 accumulation in the kernel) run the MXU at full
    # rate on v6e/v7x and halve the weight DMA; keep f32 for exact parity.
    w = w.astype(matmul_dtype)

    aux = jnp.zeros((8, w_aux), jnp.float32)
    aux = aux.at[0, :n0].set(params["b_e0"].reshape(-1))
    aux = aux.at[1, :n1].set(params["b_e1"].reshape(-1))
    aux = aux.at[2, :n1].set(params["b_d0"].reshape(-1))
    aux = aux.at[3, :n0].set(params["b_d1"].reshape(-1))
    aux = aux.at[4, :d].set(jnp.exp(0.5 * params["log_var_param"].reshape(-1)))
    aux = aux.at[5, :d].set(params["b_mean"].reshape(-1))
    aux = aux.at[5, d:d + p].set(params["b_out"].reshape(-1))
    aux = aux.at[5, d + p:d + 2 * p].set(params["b_lvn"].reshape(-1))

    return {
        "weights": w,
        "aux": aux,
        "log_var_param": params["log_var_param"].astype(jnp.float32),
        "dims": (p, d, n0, n1, slab, in_cols, w_aux, w_rows, w_cols),
        "offsets": (o_e0, o_e1, o_m, o_d0, o_d1, o_h),
    }


# ------------------------------ wrapper ------------------------------------
def gpvae_forward(x, eps, coords, packed, *, batch_tile=None):
    """Runs GPVAE.forward.  Returns (x_reconstructed, mean, log_var, x_mu,
    gp_posterior, log_var_n); the last entry mirrors the torch module's
    self.log_var_n side output."""
    p, d, n0, n1, slab, in_cols, w_aux, w_rows, w_cols = packed["dims"]
    offs = packed["offsets"]
    B = x.shape[0]

    if batch_tile is None:
        tb, B_pad = _choose_tiling(B, in_cols, slab, _tensorcores_per_chip())
    else:
        tb = batch_tile
        B_pad = _round_up(B, tb)
    assert tb % 8 == 0 and B_pad % tb == 0 and B_pad >= B

    # Lane-dense input slab [x | eps | 0]; rows >= B are zero padding that is
    # sliced away from the outputs (handles ragged / non-multiple-of-8 B).
    xe = jnp.zeros((B_pad, in_cols), jnp.float32)
    xe = xe.at[:B, :p].set(x.astype(jnp.float32))
    xe = xe.at[:B, p:p + d].set(eps.astype(jnp.float32))

    row = lambda cols: pl.BlockSpec((tb, cols), lambda i: (i, 0))
    const = lambda r, c: pl.BlockSpec((r, c), lambda i: (0, 0))

    slab_out = pl.pallas_call(
        functools.partial(_gpvae_kernel, p, d, n0, n1, slab, offs),
        out_shape=jax.ShapeDtypeStruct((B_pad, slab), jnp.float32),
        grid_spec=pltpu.PrefetchScalarGridSpec(
            num_scalar_prefetch=0,
            grid=(B_pad // tb,),
            in_specs=[
                row(in_cols),             # [x | eps] slab, streamed per step
                const(8, w_aux),          # biases + std + fused head bias
                const(w_rows, w_cols),    # all six weights, one DMA
            ],
            out_specs=row(slab),          # [mean | x_mu | log_var_n | 0]
        ),
        compiler_params=pltpu.CompilerParams(
            dimension_semantics=("parallel",)),   # shards 2-step grid on v7x
    )(xe, packed["aux"], packed["weights"])

    mean = slab_out[:B, :d]
    x_mu = slab_out[:B, d:d + p]
    log_var_n = slab_out[:B, d + p:d + 2 * p]
    # log_var is the learned per-dim parameter broadcast over the batch; no
    # need to store a constant (B, d) array from the kernel.
    log_var = jnp.broadcast_to(packed["log_var_param"].reshape(1, d), (B, d))

    # TODO(synk): gp_model is an external (GPyTorch) variational GP passed into
    # __init__; it has no Pallas equivalent, so coords are returned unchanged
    # as a placeholder for gp_posterior (callers must not treat it as one).
    gp_posterior = coords

    x_reconstructed = x_mu  # decode() returns (x_mu, x_mu)
    return x_reconstructed, mean, log_var, x_mu, gp_posterior, log_var_n


# ------------------------- reference / test harness ------------------------
def _init_params(key, p, d, n_neurons):
    """Deterministic parameter init mirroring the module's layer shapes.
    Weights are stored pre-transposed as (in_features, out_features)."""
    n0, n1 = n_neurons
    dims = [
        ("w_e0", (p, n0)), ("b_e0", (1, n0)),
        ("w_e1", (n0, n1)), ("b_e1", (1, n1)),
        ("w_mean", (n1, d)), ("b_mean", (1, d)),
        ("w_d0", (d, n1)), ("b_d0", (1, n1)),
        ("w_d1", (n1, n0)), ("b_d1", (1, n0)),
        ("w_out", (n0, p)), ("b_out", (1, p)),
        ("w_lvn", (n0, p)), ("b_lvn", (1, p)),
    ]
    params = {}
    keys = jax.random.split(key, len(dims))
    for (name, shape), k in zip(dims, keys):
        fan_in = shape[0] if name.startswith("w") else shape[1]
        scale = 1.0 / jnp.sqrt(jnp.float32(fan_in))
        params[name] = (jax.random.uniform(k, shape, jnp.float32,
                                           minval=-1.0, maxval=1.0) * scale)
    # nn.Parameter(torch.zeros(d))
    params["log_var_param"] = jnp.zeros((1, d), jnp.float32)
    return params


def _reference_forward(x, eps, params):
    hp = jax.lax.Precision.HIGHEST
    relu = lambda v: jnp.maximum(v, 0.0)
    h = relu(jnp.dot(x, params["w_e0"], precision=hp) + params["b_e0"])
    h = relu(jnp.dot(h, params["w_e1"], precision=hp) + params["b_e1"])
    mean = jnp.dot(h, params["w_mean"], precision=hp) + params["b_mean"]
    log_var = jnp.broadcast_to(params["log_var_param"], mean.shape)
    z = mean + eps * jnp.exp(0.5 * log_var)
    hd = relu(jnp.dot(z, params["w_d0"], precision=hp) + params["b_d0"])
    hd = relu(jnp.dot(hd, params["w_d1"], precision=hp) + params["b_d1"])
    x_mu = jnp.dot(hd, params["w_out"], precision=hp) + params["b_out"]
    log_var_n = jnp.dot(hd, params["w_lvn"], precision=hp) + params["b_lvn"]
    return x_mu, mean, log_var, log_var_n


if __name__ == "__main__":
    # Small shapes consistent with the module: p input features, d latent
    # dims, two hidden layers of widths n_neurons.  Default tiling collapses
    # the grid to 1 step (or 2 on a 2-TensorCore chip).
    B, p, d = 256, 16, 8
    n_neurons = (32, 32)

    key = jax.random.PRNGKey(0)
    k_param, k_x, k_eps, k_coords = jax.random.split(key, 4)

    params = _init_params(k_param, p, d, n_neurons)
    x = jax.random.normal(k_x, (B, p), jnp.float32)
    eps = jax.random.normal(k_eps, (B, d), jnp.float32)   # reparam noise
    coords = jax.random.normal(k_coords, (B, 2), jnp.float32)

    # ---- f32 matmul path ----
    packed = pack_params(params, p, d, n_neurons[0], n_neurons[1])
    outs = jax.block_until_ready(gpvae_forward(x, eps, coords, packed))
    x_rec, mean, log_var, x_mu, gp_posterior, log_var_n = outs

    ref_x_mu, ref_mean, ref_log_var, ref_lvn = _reference_forward(x, eps, params)
    assert x_rec.shape == (B, p) and mean.shape == (B, d)
    assert log_var.shape == (B, d) and x_mu.shape == (B, p)
    assert log_var_n.shape == (B, p)
    # NOTE: the kernel's jnp.dot uses the TPU's default f32 MXU path, which
    # can be lower precision than the Precision.HIGHEST reference; tolerance
    # accommodates that gap (documented, per review).
    assert jnp.allclose(mean, ref_mean, atol=2e-2, rtol=2e-2)
    assert jnp.allclose(x_mu, ref_x_mu, atol=2e-2, rtol=2e-2)
    assert jnp.allclose(log_var_n, ref_lvn, atol=2e-2, rtol=2e-2)
    assert jnp.allclose(log_var, ref_log_var, atol=1e-6, rtol=1e-6)
    assert jnp.allclose(x_rec, x_mu)

    # ---- bf16 matmul-operand path (full-rate MXU on v6e/v7x, f32 accum) ----
    packed16 = pack_params(params, p, d, n_neurons[0], n_neurons[1],
                           matmul_dtype=jnp.bfloat16)
    outs16 = jax.block_until_ready(gpvae_forward(x, eps, coords, packed16))
    assert jnp.all(jnp.isfinite(outs16[3]))
    assert jnp.allclose(outs16[3], ref_x_mu, atol=1e-1, rtol=1e-1)

    print("KERNEL_OK")
</pallas_src>

<mosaic_0001>
module attributes {stable_mosaic.version = 11 : i64} {
  func.func @_gpvae_kernel(%arg0: i32, %arg1: memref<256x128xf32, #tpu.memory_space<vmem>>, %arg2: memref<8x128xf32, #tpu.memory_space<vmem>>, %arg3: memref<152x128xf32, #tpu.memory_space<vmem>>, %arg4: memref<256x128xf32, #tpu.memory_space<vmem>>) attributes {dimension_semantics = [#tpu.dimension_semantics<parallel>], iteration_bounds = array<i64: 1>, scalar_prefetch = 0 : i64, scratch_operands = 0 : i64, tpu.core_type = #tpu.core_type<tc>, window_params = [{transform_indices = @transform_0, window_bounds = array<i64: 256, 128>}, {pipeline_mode = #tpu.pipeline_mode<synchronous>, transform_indices = @transform_1, window_bounds = array<i64: 8, 128>}, {pipeline_mode = #tpu.pipeline_mode<synchronous>, transform_indices = @transform_2, window_bounds = array<i64: 152, 128>}, {transform_indices = @transform_3, window_bounds = array<i64: 256, 128>}]} {
    %c0 = arith.constant 0 : index
    %c0_0 = arith.constant 0 : index
    %0 = vector.load %arg1[%c0, %c0_0] : memref<256x128xf32, #tpu.memory_space<vmem>>, vector<256x16xf32>
    %c0_1 = arith.constant 0 : index
    %c0_2 = arith.constant 0 : index
    %1 = vector.load %arg3[%c0_1, %c0_2] : memref<152x128xf32, #tpu.memory_space<vmem>>, vector<16x32xf32>
    %cst = arith.constant dense<0.000000e+00> : vector<256x32xf32>
    %2 = tpu.matmul %0, %1, %cst {dimension_numbers = #tpu.dot_dimension_numbers<[1], [0], [0], [1], [0, 0, 1, 1], [], []>} : vector<256x16xf32>, vector<16x32xf32>, vector<256x32xf32> -> vector<256x32xf32>
    %c0_3 = arith.constant 0 : index
    %c0_4 = arith.constant 0 : index
    %3 = vector.load %arg2[%c0_3, %c0_4] : memref<8x128xf32, #tpu.memory_space<vmem>>, vector<1x32xf32>
    %4 = vector.broadcast %3 : vector<1x32xf32> to vector<256x32xf32>
    %5 = arith.addf %2, %4 : vector<256x32xf32>
    %cst_5 = arith.constant 0.000000e+00 : f32
    %6 = vector.broadcast %cst_5 : f32 to vector<256x32xf32>
    %7 = arith.maximumf %5, %6 : vector<256x32xf32>
    %c16 = arith.constant 16 : index
    %c0_6 = arith.constant 0 : index
    %8 = vector.load %arg3[%c16, %c0_6] : memref<152x128xf32, #tpu.memory_space<vmem>>, vector<32x32xf32>
    %cst_7 = arith.constant dense<0.000000e+00> : vector<256x32xf32>
    %9 = tpu.matmul %7, %8, %cst_7 {dimension_numbers = #tpu.dot_dimension_numbers<[1], [0], [0], [1], [0, 0, 1, 1], [], []>} : vector<256x32xf32>, vector<32x32xf32>, vector<256x32xf32> -> vector<256x32xf32>
    %c1 = arith.constant 1 : index
    %c0_8 = arith.constant 0 : index
    %10 = vector.load %arg2[%c1, %c0_8] : memref<8x128xf32, #tpu.memory_space<vmem>>, vector<1x32xf32>
    %11 = vector.broadcast %10 : vector<1x32xf32> to vector<256x32xf32>
    %12 = arith.addf %9, %11 : vector<256x32xf32>
    %cst_9 = arith.constant 0.000000e+00 : f32
    %13 = vector.broadcast %cst_9 : f32 to vector<256x32xf32>
    %14 = arith.maximumf %12, %13 : vector<256x32xf32>
    %c48 = arith.constant 48 : index
    %c0_10 = arith.constant 0 : index
    %15 = vector.load %arg3[%c48, %c0_10] : memref<152x128xf32, #tpu.memory_space<vmem>>, vector<32x128xf32>
    %cst_11 = arith.constant dense<0.000000e+00> : vector<256x128xf32>
    %16 = tpu.matmul %14, %15, %cst_11 {dimension_numbers = #tpu.dot_dimension_numbers<[1], [0], [0], [1], [0, 0, 1, 1], [], []>} : vector<256x32xf32>, vector<32x128xf32>, vector<256x128xf32> -> vector<256x128xf32>
    %c5 = arith.constant 5 : index
    %c0_12 = arith.constant 0 : index
    %17 = vector.load %arg2[%c5, %c0_12] : memref<8x128xf32, #tpu.memory_space<vmem>>, vector<1x128xf32>
    %18 = vector.broadcast %17 : vector<1x128xf32> to vector<256x128xf32>
    %19 = arith.addf %16, %18 : vector<256x128xf32>
    %c0_13 = arith.constant 0 : index
    %c0_14 = arith.constant 0 : index
    %20 = vector.load %arg4[%c0_13, %c0_14] : memref<256x128xf32, #tpu.memory_space<vmem>>, vector<256x128xf32>
    tpu.vector_store %arg4[%c0_13, %c0_14], %19 {strides = array<i32>} : memref<256x128xf32, #tpu.memory_space<vmem>>, vector<256x128xf32>,
    %c0_15 = arith.constant 0 : index
    %c0_16 = arith.constant 0 : index
    %21 = vector.load %arg4[%c0_15, %c0_16] : memref<256x128xf32, #tpu.memory_space<vmem>>, vector<256x8xf32>
    %c0_17 = arith.constant 0 : index
    %c16_18 = arith.constant 16 : index
    %22 = vector.load %arg1[%c0_17, %c16_18] : memref<256x128xf32, #tpu.memory_space<vmem>>, vector<256x8xf32>
    %c4 = arith.constant 4 : index
    %c0_19 = arith.constant 0 : index
    %23 = vector.load %arg2[%c4, %c0_19] : memref<8x128xf32, #tpu.memory_space<vmem>>, vector<1x8xf32>
    %24 = vector.broadcast %23 : vector<1x8xf32> to vector<256x8xf32>
    %25 = arith.mulf %22, %24 : vector<256x8xf32>
    %26 = arith.addf %21, %25 : vector<256x8xf32>
    %c80 = arith.constant 80 : index
    %c0_20 = arith.constant 0 : index
    %27 = vector.load %arg3[%c80, %c0_20] : memref<152x128xf32, #tpu.memory_space<vmem>>, vector<8x32xf32>
    %cst_21 = arith.constant dense<0.000000e+00> : vector<256x32xf32>
    %28 = tpu.matmul %26, %27, %cst_21 {dimension_numbers = #tpu.dot_dimension_numbers<[1], [0], [0], [1], [0, 0, 1, 1], [], []>} : vector<256x8xf32>, vector<8x32xf32>, vector<256x32xf32> -> vector<256x32xf32>
    %c2 = arith.constant 2 : index
    %c0_22 = arith.constant 0 : index
    %29 = vector.load %arg2[%c2, %c0_22] : memref<8x128xf32, #tpu.memory_space<vmem>>, vector<1x32xf32>
    %30 = vector.broadcast %29 : vector<1x32xf32> to vector<256x32xf32>
    %31 = arith.addf %28, %30 : vector<256x32xf32>
    %cst_23 = arith.constant 0.000000e+00 : f32
    %32 = vector.broadcast %cst_23 : f32 to vector<256x32xf32>
    %33 = arith.maximumf %31, %32 : vector<256x32xf32>
    %c88 = arith.constant 88 : index
    %c0_24 = arith.constant 0 : index
    %34 = vector.load %arg3[%c88, %c0_24] : memref<152x128xf32, #tpu.memory_space<vmem>>, vector<32x32xf32>
    %cst_25 = arith.constant dense<0.000000e+00> : vector<256x32xf32>
    %35 = tpu.matmul %33, %34, %cst_25 {dimension_numbers = #tpu.dot_dimension_numbers<[1], [0], [0], [1], [0, 0, 1, 1], [], []>} : vector<256x32xf32>, vector<32x32xf32>, vector<256x32xf32> -> vector<256x32xf32>
    %c3 = arith.constant 3 : index
    %c0_26 = arith.constant 0 : index
    %36 = vector.load %arg2[%c3, %c0_26] : memref<8x128xf32, #tpu.memory_space<vmem>>, vector<1x32xf32>
    %37 = vector.broadcast %36 : vector<1x32xf32> to vector<256x32xf32>
    %38 = arith.addf %35, %37 : vector<256x32xf32>
    %cst_27 = arith.constant 0.000000e+00 : f32
    %39 = vector.broadcast %cst_27 : f32 to vector<256x32xf32>
    %40 = arith.maximumf %38, %39 : vector<256x32xf32>
    %c0_28 = arith.constant 0 : index
    %c0_29 = arith.constant 0 : index
    %41 = vector.load %arg4[%c0_28, %c0_29] : memref<256x128xf32, #tpu.memory_space<vmem>>, vector<256x128xf32>
    %c120 = arith.constant 120 : index
    %c0_30 = arith.constant 0 : index
    %42 = vector.load %arg3[%c120, %c0_30] : memref<152x128xf32, #tpu.memory_space<vmem>>, vector<32x128xf32>
    %cst_31 = arith.constant dense<0.000000e+00> : vector<256x128xf32>
    %43 = tpu.matmul %40, %42, %cst_31 {dimension_numbers = #tpu.dot_dimension_numbers<[1], [0], [0], [1], [0, 0, 1, 1], [], []>} : vector<256x32xf32>, vector<32x128xf32>, vector<256x128xf32> -> vector<256x128xf32>
    %44 = arith.addf %41, %43 : vector<256x128xf32>
    %c0_32 = arith.constant 0 : index
    %c0_33 = arith.constant 0 : index
    %45 = vector.load %arg4[%c0_32, %c0_33] : memref<256x128xf32, #tpu.memory_space<vmem>>, vector<256x128xf32>
    tpu.vector_store %arg4[%c0_32, %c0_33], %44 {strides = array<i32>} : memref<256x128xf32, #tpu.memory_space<vmem>>, vector<256x128xf32>,
    return
  }
  func.func @transform_0(%arg0: i32) -> (i32, i32) {
    %c0_i32 = arith.constant 0 : i32
    %c0_i32_0 = arith.constant 0 : i32
    return %arg0, %c0_i32 : i32, i32
  }
  func.func @transform_1(%arg0: i32) -> (i32, i32) {
    %c0_i32 = arith.constant 0 : i32
    %c0_i32_0 = arith.constant 0 : i32
    %c0_i32_1 = arith.constant 0 : i32
    return %c0_i32, %c0_i32_0 : i32, i32
  }
  func.func @transform_2(%arg0: i32) -> (i32, i32) {
    %c0_i32 = arith.constant 0 : i32
    %c0_i32_0 = arith.constant 0 : i32
    %c0_i32_1 = arith.constant 0 : i32
    return %c0_i32, %c0_i32_0 : i32, i32
  }
  func.func @transform_3(%arg0: i32) -> (i32, i32) {
    %c0_i32 = arith.constant 0 : i32
    %c0_i32_0 = arith.constant 0 : i32
    return %arg0, %c0_i32 : i32, i32
  }
}

</mosaic_0001>

<bundles_post_ra>
// kernel: tpu_custom_call.1
= control target key start
LH: loop header
LB: loop body
LE: loop exit
PB: predicated region body
PF: predicated region fallthrough
CT: control target
= control target key end

     0   :  { %8 = vsyncpa [#allocation3], 0  ;;  %s4215_s0 = inlined_call_operand.hbm [shape: f32[256,128], index: 0, kind: input, shape index: {}]   ;;  %s4216_s1 = inlined_call_operand.hbm [shape: f32[8,128], index: 1, kind: input, shape index: {}]   ;;  %s4217_s2 = inlined_call_operand.hbm [shape: f32[152,128], index: 2, kind: input, shape index: {}]   ;;  %s4218_s3 = inlined_call_operand.hbm [shape: f32[256,128], index: 3, kind: output, shape index: {}]  }
   0x1   :  { %9 = vsyncpa [#allocation6], 0 }
   0x2   :  { %10 = vsyncpa [#allocation4], 0  ;;  %s3439_s12 = smov [#allocation5]   ;;  %s3440_s14 = smov [#allocation2]  }
   0x3   :  { %s29_s13 = sshll.u32 %s3439_s12, 4  ;;  %s16_s15 = sshll.u32 %s3440_s14, 4  ;;  %s30_s13 = int_to_ptr.vmem [resolvable:$true] %s29_s13  ;;  %s3467_s15 = int_to_ptr.vmem [resolvable:$true] %s16_s15 }
   0x4   :  { %s3345_s18 = scalar_lea.hbm %s4216_s1, 128 }
   0x5   :  { %p3346_p0 = scmp.ne.s32.totalorder %s4216_s1, %s3345_s18  ;;  %p3349_p1 = scmp.lt.u32.totalorder %s3345_s18, %s4216_s1 }
   0x7   :  { %p3351_p2 = pnand %p3349_p1, %p3346_p0 }
   0x9   :  { %3354 = shalt.err (!%p3351_p2)
}
   0xa   :  { %s3355_s23 = scalar_lea.vmem %s30_s13, 128  ;;  %p3360_p4 = scmp.lt.s32.totalorder %s30_s13, %s30_s13 }
   0xb   :  { %p3356_p3 = scmp.ne.s32.totalorder %s30_s13, %s3355_s23  ;;  %p3361_p5 = scmp.lt.s32.totalorder %s3355_s23, %s3355_s23 }
   0xd   :  { %p3362_p6 = por %p3361_p5, %p3360_p4 }
   0xf   :  { %p3363_p7 = pnand %p3362_p6, %p3356_p3 }
  0x11   :  { %3366 = shalt.err (!%p3363_p7)
}
  0x12   :  { %32 = dma.hbm_to_vmem [thread:$0]  %s4216_s1, 128, %s30_s13, [#allocation6]  }
  0x13   :  { %s3367_s28 = scalar_lea.hbm %s4215_s0, 4096 }
  0x14   :  { %p3368_p8 = scmp.ne.s32.totalorder %s4215_s0, %s3367_s28  ;;  %p3371_p9 = scmp.lt.u32.totalorder %s3367_s28, %s4215_s0 }
  0x16   :  { %p3373_p10 = pnand %p3371_p9, %p3368_p8 }
  0x18   :  { %3376 = shalt.err (!%p3373_p10)
}
  0x19   :  { %s3377_s6 = scalar_lea.vmem %s3467_s15, 4096  ;;  %p3382_p12 = scmp.lt.s32.totalorder %s3467_s15, %s3467_s15 }
  0x1a   :  { %p3378_p11 = scmp.ne.s32.totalorder %s3467_s15, %s3377_s6  ;;  %p3383_p13 = scmp.lt.s32.totalorder %s3377_s6, %s3377_s6 }
  0x1c   :  { %p3384_p0 = por %p3383_p13, %p3382_p12 }
  0x1e   :  { %p3385_p1 = pnand %p3384_p0, %p3378_p11 }
  0x20   :  { %3388 = shalt.err (!%p3385_p1)
}
  0x21   :  { %s3441_s1 = smov 128   ;;  %s3442_s7 = smov 8  }
  0x22   :  { %22 = dma.hbm_to_vmem [thread:$0]  %s4215_s0, 4096, %s3467_s15, [#allocation3], %s3441_s1, %s3441_s1, %s3442_s7  }
  0x23   :  { %s3443_s10 = smov [#allocation7]   ;;  %s3389_s14 = scalar_lea.hbm %s4217_s2, 2432 }
  0x24   :  { %s38_s11 = sshll.u32 %s3443_s10, 4  ;;  %p3390_p2 = scmp.ne.s32.totalorder %s4217_s2, %s3389_s14  ;;  %s39_s11 = int_to_ptr.vmem [resolvable:$true] %s38_s11 }
  0x25   :  { %p3393_p3 = scmp.lt.u32.totalorder %s3389_s14, %s4217_s2 }
  0x27   :  { %p3395_p4 = pnand %p3393_p3, %p3390_p2 }
  0x29   :  { %3398 = shalt.err (!%p3395_p4)
}
  0x2a   :  { %s3399_s20 = scalar_lea.vmem %s39_s11, 2432  ;;  %p3404_p6 = scmp.lt.s32.totalorder %s39_s11, %s39_s11 }
  0x2b   :  { %p3400_p5 = scmp.ne.s32.totalorder %s39_s11, %s3399_s20  ;;  %p3405_p7 = scmp.lt.s32.totalorder %s3399_s20, %s3399_s20 }
  0x2d   :  { %p3406_p8 = por %p3405_p7, %p3404_p6 }
  0x2f   :  { %p3407_p9 = pnand %p3406_p8, %p3400_p5 }
  0x31   :  { %3410 = shalt.err (!%p3407_p9)
}
  0x32   :  { %44 = dma.hbm_to_vmem [thread:$0]  %s4217_s2, 2432, %s39_s11, [#allocation6], %s3441_s1, %s3441_s1, %s3442_s7  }
  0x33   :  { %3433 = dma.done.wait [#allocation3], 4096  }
  0x34   :  { %3434 = vsyncadd [#allocation3], 4294963200 }
  0x35   :  { %3435 = dma.done.wait [#allocation6], 2560  }
  0x36   :  { %3436 = vsyncadd [#allocation6], 4294964736  ;;  %vm93_vm0 = vcmask 130048   ;;  %v86_v0 = vld [vmem:[#allocation7] sm:$0xff]  ;;  %v87_v1 = vld [vmem:[#allocation7 + $0x8] sm:$0xff]  ;;  %s3444_s2 = smov 16  }
  0x37   :  { %v3516_v2 = vld [vmem:[#allocation2] sm:$0xff]  ;;  %v3301_v3 = vpack.c.bf16 %v87_v1, %v86_v0  ;;  %v3520_v4 = vld [vmem:[#allocation2 + $0x8] sm:$0xff]  ;;  %v3522_v5 = vld [vmem:[#allocation2 + $0x10] sm:$0xff]  ;;  %vm456_vm1 = vcmask 261120   ;;  %s3445_s21 = smov 112   ;;  %vm1443_vm2 = vcmask 64512  }
  0x38   :  { %2979 = vmatprep.mubr.msk.f32.mxu0 %vm93_vm0, %v3516_v2  ;;  %v3528_v6 = vld [vmem:[#allocation2 + $0x18] sm:$0xff]  ;;  %v3530_v7 = vld [vmem:[#allocation2 + $0x20] sm:$0xff]  ;;  %v3536_v10 = vld [vmem:[#allocation2 + $0x28] sm:$0xff]  ;;  %s3446_s22 = smov [#allocation8]  }
  0x39   :  { %3302 = vmatprep.subr.bf16.mxu0 %v3301_v3  ;;  %v447_v8 = vld [vmem:[#allocation7 + $0x10] sm:$0xff]  ;;  %v448_v9 = vld [vmem:[#allocation7 + $0x18] sm:$0xff]  ;;  %v3538_v12 = vld [vmem:[#allocation2 + $0x30] sm:$0xff]  ;;  %s2553_s23 = sshll.u32 %s3446_s22, 4  ;;  %s2554_s23 = int_to_ptr.vmem [resolvable:$true] %s2553_s23 }
  0x3a   :  { %3304 = vmatpush3.bf16.msra.mxu0 %v3301_v3  ;;  %v3305_v11 = vpack.c.bf16 %v448_v9, %v447_v8  ;;  %v3544_v13 = vld [vmem:[#allocation2 + $0x38] sm:$0xff]  ;;  %v3546_v14 = vld [vmem:[#allocation2 + $0x40] sm:$0xff]  ;;  %v3552_v15 = vld [vmem:[#allocation2 + $0x48] sm:$0xff]  ;;  %s3411_s24 = scalar_lea.vmem %s2554_s23, 4096  ;;  %p3416_p11 = scmp.lt.s32.totalorder %s2554_s23, %s2554_s23 }
  0x3b   :  { %v3554_v16 = vld [vmem:[#allocation2 + $0x50] sm:$0xff]  ;;  %v3560_v17 = vld [vmem:[#allocation2 + $0x58] sm:$0xff]  ;;  %v3562_v18 = vld [vmem:[#allocation2 + $0x60] sm:$0xff]  ;;  %p3412_p10 = scmp.ne.s32.totalorder %s2554_s23, %s3411_s24  ;;  %p3417_p12 = scmp.lt.s32.totalorder %s3411_s24, %s3411_s24 }
  0x3c   :  { %3306 = vmatprep.subr.bf16.mxu1 %v3305_v11  ;;  %v3568_v19 = vld [vmem:[#allocation2 + $0x68] sm:$0xff]  ;;  %v3570_v20 = vld [vmem:[#allocation2 + $0x70] sm:$0xff]  ;;  %v3576_v21 = vld [vmem:[#allocation2 + $0x78] sm:$0xff] }
  0x3d   :  { %2980 = vmatmul.mubr.msk.f32.vlgmr.msra.gmra.mrb[0].mxu0 %vm93_vm0, %v3520_v4  ;;  %3308 = vmatpush3.bf16.msra.mxu1 %v3305_v11  ;;  %v3578_v22 = vld [vmem:[#allocation2 + $0x80] sm:$0xff]  ;;  %v3584_v23 = vld [vmem:[#allocation2 + $0x88] sm:$0xff]  ;;  %v3586_v24 = vld [vmem:[#allocation2 + $0x90] sm:$0xff]  ;;  %p3418_p13 = por %p3417_p12, %p3416_p11 }
  0x3e   :  { %2982 = vmatprep.mubr.msk.f32.mxu0 %vm93_vm0, %v3522_v5  ;;  %v3592_v25 = vld [vmem:[#allocation2 + $0x98] sm:$0xff]  ;;  %v3594_v26 = vld [vmem:[#allocation2 + $0xa0] sm:$0xff]  ;;  %v3600_v27 = vld [vmem:[#allocation2 + $0xa8] sm:$0xff] }
  0x3f   :  { %v3602_v28 = vld [vmem:[#allocation2 + $0xb0] sm:$0xff]  ;;  %v3608_v29 = vld [vmem:[#allocation2 + $0xb8] sm:$0xff]  ;;  %v3610_v30 = vld [vmem:[#allocation2 + $0xc0] sm:$0xff]  ;;  %p3419_p0 = pnand %p3418_p13, %p3412_p10 }
  0x40   :  { %v3616_v31 = vld [vmem:[#allocation2 + $0xc8] sm:$0xff]  ;;  %v3618_v32 = vld [vmem:[#allocation2 + $0xd0] sm:$0xff]  ;;  %v3624_v33 = vld [vmem:[#allocation2 + $0xd8] sm:$0xff] }
  0x41   :  { %2983 = vmatmul.mubr.msk.f32.gmra.mrb[2].mxu0 %vm93_vm0, %v3528_v6  ;;  %v3626_v34 = vld [vmem:[#allocation2 + $0xe0] sm:$0xff]  ;;  %v3632_v35 = vld [vmem:[#allocation2 + $0xe8] sm:$0xff]  ;;  %v3634_v36 = vld [vmem:[#allocation2 + $0xf0] sm:$0xff] }
  0x42   :  { %2985 = vmatprep.mubr.msk.f32.mxu0 %vm93_vm0, %v3530_v7  ;;  %v3640_v37 = vld [vmem:[#allocation2 + $0xf8] sm:$0xff]  ;;  %v449_v38 = vld [vmem:[#allocation7 + $0x20] sm:$0xff]  ;;  %v450_v39 = vld [vmem:[#allocation7 + $0x28] sm:$0xff] }
  0x43   :  { %v3309_v40 = vpack.c.bf16 %v450_v39, %v449_v38  ;;  %v2665_v41 = vld [vmem:[#allocation5 + $0x4] ss:$0 sm:$0xff]  ;;  %v810_v42 = vld [vmem:[#allocation7 + $0x30] sm:$0xff]  ;;  %v812_v45 = vld [vmem:[#allocation7 + $0x40] sm:$0xff] }
  0x44   :  { %v811_v43 = vld [vmem:[#allocation7 + $0x38] sm:$0xff]  ;;  %1242 = vrot.lane.b32.xlu0 %v2665_v41, %s3444_s2  ;;  %v813_v46 = vld [vmem:[#allocation7 + $0x48] sm:$0xff] }
  0x45   :  { %2986 = vmatmul.mubr.msk.f32.gmra.mrb[4].mxu0 %vm93_vm0, %v3536_v10  ;;  %3310 = vmatprep.subr.bf16.mxu1 %v3309_v40  ;;  %v3313_v44 = vpack.c.bf16 %v811_v43, %v810_v42  ;;  %v3317_v47 = vpack.c.bf16 %v813_v46, %v812_v45  ;;  %v3644_v48 = vld [vmem:[#allocation5] ss:$0 sm:$0xff] }
  0x46   :  { %2988 = vmatprep.mubr.msk.f32.mxu0 %vm93_vm0, %v3538_v12  ;;  %3312 = vmatpush3.bf16.msra.mxu1 %v3309_v40 }
  0x47   :  { %3314 = vmatprep.subr.bf16.mxu0 %v3313_v44 }
  0x48   :  { %3316 = vmatpush3.bf16.msra.mxu0 %v3313_v44 }
  0x49   :  { %2989 = vmatmul.mubr.msk.f32.gmra.mrb[6].mxu0 %vm93_vm0, %v3544_v13  ;;  %3318 = vmatprep.subr.bf16.mxu0 %v3317_v47 }
  0x4a   :  { %2991 = vmatprep.mubr.msk.f32.mxu0 %vm93_vm0, %v3546_v14 }
  0x4c   :  { %3320 = vmatpush3.bf16.msra.mxu0 %v3317_v47 }
  0x4d   :  { %2992 = vmatmul.mubr.msk.f32.gmra.mrb[8].mxu0 %vm93_vm0, %v3552_v15 }
  0x4e   :  { %2994 = vmatprep.mubr.msk.f32.mxu0 %vm93_vm0, %v3554_v16 }
  0x51   :  { %2995 = vmatmul.mubr.msk.f32.gmra.mrb[10].mxu0 %vm93_vm0, %v3560_v17 }
  0x52   :  { %2997 = vmatprep.mubr.msk.f32.mxu0 %vm93_vm0, %v3562_v18 }
  0x55   :  { %2998 = vmatmul.mubr.msk.f32.gmra.mrb[12].mxu0 %vm93_vm0, %v3568_v19 }
  0x56   :  { %3000 = vmatprep.mubr.msk.f32.mxu0 %vm93_vm0, %v3570_v20 }
  0x59   :  { %3001 = vmatmul.mubr.msk.f32.gmra.mrb[14].mxu0 %vm93_vm0, %v3576_v21 }
  0x5a   :  { %3003 = vmatprep.mubr.msk.f32.mxu0 %vm93_vm0, %v3578_v22 }
  0x5d   :  { %3004 = vmatmul.mubr.msk.f32.gmra.mrb[16].mxu0 %vm93_vm0, %v3584_v23 }
  0x5e   :  { %3006 = vmatprep.mubr.msk.f32.mxu0 %vm93_vm0, %v3586_v24 }
  0x61   :  { %3007 = vmatmul.mubr.msk.f32.gmra.mrb[18].mxu0 %vm93_vm0, %v3592_v25 }
  0x62   :  { %3009 = vmatprep.mubr.msk.f32.mxu0 %vm93_vm0, %v3594_v26 }
  0x65   :  { %3010 = vmatmul.mubr.msk.f32.gmra.mrb[20].mxu0 %vm93_vm0, %v3600_v27 }
  0x66   :  { %3012 = vmatprep.mubr.msk.f32.mxu0 %vm93_vm0, %v3602_v28 }
  0x69   :  { %3013 = vmatmul.mubr.msk.f32.gmra.mrb[22].mxu0 %vm93_vm0, %v3608_v29 }
  0x6a   :  { %3015 = vmatprep.mubr.msk.f32.mxu0 %vm93_vm0, %v3610_v30 }
  0x6d   :  { %3016 = vmatmul.mubr.msk.f32.gmra.mrb[24].mxu0 %vm93_vm0, %v3616_v31 }
  0x6e   :  { %3018 = vmatprep.mubr.msk.f32.mxu0 %vm93_vm0, %v3618_v32 }
  0x71   :  { %3019 = vmatmul.mubr.msk.f32.gmra.mrb[26].mxu0 %vm93_vm0, %v3624_v33 }
  0x72   :  { %3021 = vmatprep.mubr.msk.f32.mxu0 %vm93_vm0, %v3626_v34 }
  0x75   :  { %3022 = vmatmul.mubr.msk.f32.gmra.mrb[28].mxu0 %vm93_vm0, %v3632_v35 }
  0x76   :  { %3024 = vmatprep.mubr.msk.f32.mxu0 %vm93_vm0, %v3634_v36 }
  0x79   :  { %3025 = vmatmul.mubr.msk.f32.gmra.mrb[30].mxu0 %vm93_vm0, %v3640_v37 }
 0x110   :  { %v2981_v49 = vpop.f32.mrb[0].mxu0 }
 0x111   :  { %v262_v50 = vadd.f32 %v2981_v49, %v3644_v48  ;;  %v256_v51 = vpop.f32.mrb[1].mxu0 }
 0x112   :  { %v257_v52 = vadd.f32 %v3644_v48, %v256_v51 }
 0x113   :  { %v416_v55 = vmax.f32 %v262_v50, 0.0 }
 0x114   :  { %v415_v53 = vmax.f32 %v257_v52, 0.0  ;;  %v2984_v54 = vpop.f32.mrb[2].mxu0 }
 0x115   :  { %v272_v56 = vadd.f32 %v2984_v54, %v3644_v48  ;;  %v266_v57 = vpop.f32.mrb[3].mxu0 }
 0x116   :  { %v267_v58 = vadd.f32 %v3644_v48, %v266_v57  ;;  %3035 = vmatprep.mubr.msk.f32.mxu1 %vm456_vm1, %v415_v53 }
 0x117   :  { %3036 = vmatmul.mubr.msk.f32.vlgmr.msra.gmra.mrb[0].mxu1 %vm456_vm1, %v416_v55  ;;  %v418_v61 = vmax.f32 %v272_v56, 0.0 }
 0x118   :  { %v417_v59 = vmax.f32 %v267_v58, 0.0  ;;  %v2987_v60 = vpop.f32.mrb[4].mxu0 }
 0x119   :  { %v282_v62 = vadd.f32 %v2987_v60, %v3644_v48  ;;  %v276_v63 = vpop.f32.mrb[5].mxu0 }
 0x11a   :  { %v277_v0 = vadd.f32 %v3644_v48, %v276_v63  ;;  %3038 = vmatprep.mubr.msk.f32.mxu1 %vm456_vm1, %v417_v59 }
 0x11b   :  { %3039 = vmatmul.mubr.msk.f32.gmra.mrb[2].mxu1 %vm456_vm1, %v418_v61  ;;  %v420_v8 = vmax.f32 %v282_v62, 0.0 }
 0x11c   :  { %v419_v1 = vmax.f32 %v277_v0, 0.0  ;;  %v2990_v3 = vpop.f32.mrb[6].mxu0 }
 0x11d   :  { %v292_v9 = vadd.f32 %v2990_v3, %v3644_v48  ;;  %v286_v11 = vpop.f32.mrb[7].mxu0 }
 0x11e   :  { %v287_v38 = vadd.f32 %v3644_v48, %v286_v11  ;;  %3041 = vmatprep.mubr.msk.f32.mxu1 %vm456_vm1, %v419_v1 }
 0x11f   :  { %3042 = vmatmul.mubr.msk.f32.gmra.mrb[4].mxu1 %vm456_vm1, %v420_v8  ;;  %v422_v41 = vmax.f32 %v292_v9, 0.0 }
 0x120   :  { %v421_v39 = vmax.f32 %v287_v38, 0.0  ;;  %v2993_v40 = vpop.f32.mrb[8].mxu0 }
 0x121   :  { %v302_v42 = vadd.f32 %v2993_v40, %v3644_v48  ;;  %v296_v43 = vpop.f32.mrb[9].mxu0 }
 0x122   :  { %v297_v44 = vadd.f32 %v3644_v48, %v296_v43  ;;  %3044 = vmatprep.mubr.msk.f32.mxu1 %vm456_vm1, %v421_v39 }
 0x123   :  { %3045 = vmatmul.mubr.msk.f32.gmra.mrb[6].mxu1 %vm456_vm1, %v422_v41  ;;  %v424_v47 = vmax.f32 %v302_v42, 0.0 }
 0x124   :  { %v423_v45 = vmax.f32 %v297_v44, 0.0  ;;  %v2996_v46 = vpop.f32.mrb[10].mxu0 }
 0x125   :  { %v312_v49 = vadd.f32 %v2996_v46, %v3644_v48  ;;  %v306_v50 = vpop.f32.mrb[11].mxu0 }
 0x126   :  { %v307_v51 = vadd.f32 %v3644_v48, %v306_v50  ;;  %3047 = vmatprep.mubr.msk.f32.mxu1 %vm456_vm1, %v423_v45 }
 0x127   :  { %3048 = vmatmul.mubr.msk.f32.gmra.mrb[8].mxu1 %vm456_vm1, %v424_v47  ;;  %v426_v54 = vmax.f32 %v312_v49, 0.0 }
 0x128   :  { %v425_v52 = vmax.f32 %v307_v51, 0.0  ;;  %v2999_v53 = vpop.f32.mrb[12].mxu0 }
 0x129   :  { %v322_v55 = vadd.f32 %v2999_v53, %v3644_v48  ;;  %v316_v56 = vpop.f32.mrb[13].mxu0 }
 0x12a   :  { %v317_v57 = vadd.f32 %v3644_v48, %v316_v56  ;;  %3050 = vmatprep.mubr.msk.f32.mxu1 %vm456_vm1, %v425_v52 }
 0x12b   :  { %3051 = vmatmul.mubr.msk.f32.gmra.mrb[10].mxu1 %vm456_vm1, %v426_v54  ;;  %v428_v60 = vmax.f32 %v322_v55, 0.0 }
 0x12c   :  { %v427_v58 = vmax.f32 %v317_v57, 0.0  ;;  %v3002_v59 = vpop.f32.mrb[14].mxu0 }
 0x12d   :  { %v332_v61 = vadd.f32 %v3002_v59, %v3644_v48  ;;  %v326_v62 = vpop.f32.mrb[15].mxu0 }
 0x12e   :  { %v327_v63 = vadd.f32 %v3644_v48, %v326_v62  ;;  %3053 = vmatprep.mubr.msk.f32.mxu1 %vm456_vm1, %v427_v58 }
 0x12f   :  { %3054 = vmatmul.mubr.msk.f32.gmra.mrb[12].mxu1 %vm456_vm1, %v428_v60  ;;  %v430_v3 = vmax.f32 %v332_v61, 0.0 }
 0x130   :  { %v429_v0 = vmax.f32 %v327_v63, 0.0  ;;  %v3005_v1 = vpop.f32.mrb[16].mxu0 }
 0x131   :  { %v342_v8 = vadd.f32 %v3005_v1, %v3644_v48  ;;  %v336_v9 = vpop.f32.mrb[17].mxu0 }
 0x132   :  { %v337_v11 = vadd.f32 %v3644_v48, %v336_v9  ;;  %3056 = vmatprep.mubr.msk.f32.mxu1 %vm456_vm1, %v429_v0 }
 0x133   :  { %3057 = vmatmul.mubr.msk.f32.gmra.mrb[14].mxu1 %vm456_vm1, %v430_v3  ;;  %v432_v40 = vmax.f32 %v342_v8, 0.0 }
 0x134   :  { %v431_v38 = vmax.f32 %v337_v11, 0.0  ;;  %v3008_v39 = vpop.f32.mrb[18].mxu0 }
 0x135   :  { %v352_v41 = vadd.f32 %v3008_v39, %v3644_v48  ;;  %v346_v42 = vpop.f32.mrb[19].mxu0 }
 0x136   :  { %v347_v43 = vadd.f32 %v3644_v48, %v346_v42  ;;  %3059 = vmatprep.mubr.msk.f32.mxu1 %vm456_vm1, %v431_v38 }
 0x137   :  { %3060 = vmatmul.mubr.msk.f32.gmra.mrb[16].mxu1 %vm456_vm1, %v432_v40  ;;  %v434_v46 = vmax.f32 %v352_v41, 0.0 }
 0x138   :  { %v433_v44 = vmax.f32 %v347_v43, 0.0  ;;  %v3011_v45 = vpop.f32.mrb[20].mxu0 }
 0x139   :  { %v362_v47 = vadd.f32 %v3011_v45, %v3644_v48  ;;  %v356_v49 = vpop.f32.mrb[21].mxu0 }
 0x13a   :  { %v357_v50 = vadd.f32 %v3644_v48, %v356_v49  ;;  %3062 = vmatprep.mubr.msk.f32.mxu1 %vm456_vm1, %v433_v44 }
 0x13b   :  { %3063 = vmatmul.mubr.msk.f32.gmra.mrb[18].mxu1 %vm456_vm1, %v434_v46  ;;  %v436_v53 = vmax.f32 %v362_v47, 0.0 }
 0x13c   :  { %v435_v51 = vmax.f32 %v357_v50, 0.0  ;;  %v3014_v52 = vpop.f32.mrb[22].mxu0 }
 0x13d   :  { %v372_v54 = vadd.f32 %v3014_v52, %v3644_v48  ;;  %v366_v55 = vpop.f32.mrb[23].mxu0  ;;  %v3710_v52 = vpop.permute.xlu0 %1242 }
 0x13e   :  { %v367_v56 = vadd.f32 %v3644_v48, %v366_v55  ;;  %3065 = vmatprep.mubr.msk.f32.mxu1 %vm456_vm1, %v435_v51  ;;  %v1248_v55 = vmul.f32 %v3710_v52, %v3528_v6  ;;  %v1252_v6 = vmul.f32 %v3710_v52, %v3544_v13  ;;  %v1256_v13 = vmul.f32 %v3710_v52, %v3560_v17 }
 0x13f   :  { %3066 = vmatmul.mubr.msk.f32.gmra.mrb[20].mxu1 %vm456_vm1, %v436_v53  ;;  %v438_v59 = vmax.f32 %v372_v54, 0.0  ;;  %v1246_v53 = vmul.f32 %v3710_v52, %v3520_v4  ;;  %v1245_v54 = vmul.f32 %v3710_v52, %v3516_v2  ;;  %v1249_v4 = vmul.f32 %v3710_v52, %v3530_v7 }
 0x140   :  { %v437_v57 = vmax.f32 %v367_v56, 0.0  ;;  %v3017_v58 = vpop.f32.mrb[24].mxu0  ;;  %v1250_v2 = vmul.f32 %v3710_v52, %v3536_v10  ;;  %v1253_v7 = vmul.f32 %v3710_v52, %v3546_v14  ;;  %v1254_v10 = vmul.f32 %v3710_v52, %v3552_v15  ;;  %v1437_v56 = vld [vmem:[#allocation7 + $0x50] sm:$0xff] }
 0x141   :  { %v382_v60 = vadd.f32 %v3017_v58, %v3644_v48  ;;  %v376_v61 = vpop.f32.mrb[25].mxu0  ;;  %1311 = vrot.lane.b32.xlu1 %v1246_v53, %s3445_s21  ;;  %1309 = vrot.lane.b32.xlu0 %v1245_v54, %s3445_s21  ;;  %v1257_v14 = vmul.f32 %v3710_v52, %v3562_v18  ;;  %v1258_v15 = vmul.f32 %v3710_v52, %v3568_v19 }
 0x142   :  { %v377_v62 = vadd.f32 %v3644_v48, %v376_v61  ;;  %3068 = vmatprep.mubr.msk.f32.mxu1 %vm456_vm1, %v437_v57  ;;  %3139 = vmatprep.subr.mxu1 %v1437_v56  ;;  %v1260_v17 = vmul.f32 %v3710_v52, %v3576_v21  ;;  %v1261_v18 = vmul.f32 %v3710_v52, %v3578_v22  ;;  %v3808_v57 = vld [vmem:[#allocation5 + $0x1] ss:$0 sm:$0xff] }
 0x143   :  { %3069 = vmatmul.mubr.msk.f32.gmra.mrb[22].mxu1 %vm456_vm1, %v438_v59  ;;  %v440_v1 = vmax.f32 %v382_v60, 0.0  ;;  %v1262_v19 = vmul.f32 %v3710_v52, %v3584_v23  ;;  %v1264_v21 = vmul.f32 %v3710_v52, %v3592_v25  ;;  %v1265_v22 = vmul.f32 %v3710_v52, %v3594_v26 }
 0x144   :  { %v439_v63 = vmax.f32 %v377_v62, 0.0  ;;  %v3020_v0 = vpop.f32.mrb[26].mxu0  ;;  %3140 = vmatpush3.msra.mxu1 %v1437_v56  ;;  %v1266_v23 = vmul.f32 %v3710_v52, %v3600_v27  ;;  %v1268_v25 = vmul.f32 %v3710_v52, %v3608_v29  ;;  %v1269_v26 = vmul.f32 %v3710_v52, %v3610_v30 }
 0x145   :  { %v392_v3 = vadd.f32 %v3020_v0, %v3644_v48  ;;  %v386_v8 = vpop.f32.mrb[27].mxu0  ;;  %1315 = vrot.lane.b32.xlu0 %v1248_v55, %s3445_s21  ;;  %v1270_v27 = vmul.f32 %v3710_v52, %v3616_v31  ;;  %v1272_v29 = vmul.f32 %v3710_v52, %v3624_v33  ;;  %v1273_v30 = vmul.f32 %v3710_v52, %v3626_v34 }
 0x146   :  { %v387_v9 = vadd.f32 %v3644_v48, %v386_v8  ;;  %3071 = vmatprep.mubr.msk.f32.mxu1 %vm456_vm1, %v439_v63  ;;  %v1274_v31 = vmul.f32 %v3710_v52, %v3632_v35  ;;  %v1276_v33 = vmul.f32 %v3710_v52, %v3640_v37 }
 0x147   :  { %3072 = vmatmul.mubr.msk.f32.gmra.mrb[24].mxu1 %vm456_vm1, %v440_v1  ;;  %v442_v39 = vmax.f32 %v392_v3, 0.0 }
 0x148   :  { %v441_v11 = vmax.f32 %v387_v9, 0.0  ;;  %v3023_v38 = vpop.f32.mrb[28].mxu0 }
 0x149   :  { %v402_v40 = vadd.f32 %v3023_v38, %v3644_v48  ;;  %v396_v41 = vpop.f32.mrb[29].mxu0  ;;  %1319 = vrot.lane.b32.xlu0 %v1250_v2, %s3445_s21 }
 0x14a   :  { %v397_v42 = vadd.f32 %v3644_v48, %v396_v41  ;;  %3074 = vmatprep.mubr.msk.f32.mxu1 %vm456_vm1, %v441_v11 }
 0x14b   :  { %3075 = vmatmul.mubr.msk.f32.gmra.mrb[26].mxu1 %vm456_vm1, %v442_v39  ;;  %v444_v45 = vmax.f32 %v402_v40, 0.0 }
 0x14c   :  { %v443_v43 = vmax.f32 %v397_v42, 0.0  ;;  %v3026_v44 = vpop.f32.mrb[30].mxu0 }
 0x14d   :  { %v412_v46 = vadd.f32 %v3026_v44, %v3644_v48  ;;  %v406_v47 = vpop.f32.mrb[31].mxu0  ;;  %1323 = vrot.lane.b32.xlu0 %v1252_v6, %s3445_s21 }
 0x14e   :  { %v407_v49 = vadd.f32 %v3644_v48, %v406_v47  ;;  %3077 = vmatprep.mubr.msk.f32.mxu1 %vm456_vm1, %v443_v43  ;;  %v1247_v48 = vmul.f32 %v3710_v52, %v3522_v5  ;;  %v1251_v5 = vmul.f32 %v3710_v52, %v3538_v12  ;;  %v1255_v12 = vmul.f32 %v3710_v52, %v3554_v16 }
 0x14f   :  { %3078 = vmatmul.mubr.msk.f32.gmra.mrb[28].mxu1 %vm456_vm1, %v444_v45  ;;  %v446_v51 = vmax.f32 %v412_v46, 0.0  ;;  %v1259_v16 = vmul.f32 %v3710_v52, %v3570_v20  ;;  %v1263_v20 = vmul.f32 %v3710_v52, %v3586_v24  ;;  %v1267_v24 = vmul.f32 %v3710_v52, %v3602_v28 }
 0x150   :  { %v445_v50 = vmax.f32 %v407_v49, 0.0  ;;  %1313 = vrot.lane.b32.xlu1 %v1247_v48, %s3445_s21  ;;  %v1271_v28 = vmul.f32 %v3710_v52, %v3618_v32  ;;  %v1275_v32 = vmul.f32 %v3710_v52, %v3634_v36 }
 0x151   :  { %1327 = vrot.lane.b32.xlu0 %v1254_v10, %s3445_s21 }
 0x152   :  { %3080 = vmatprep.mubr.msk.f32.mxu1 %vm456_vm1, %v445_v50 }
 0x153   :  { %3081 = vmatmul.mubr.msk.f32.gmra.mrb[30].mxu1 %vm456_vm1, %v446_v51 }
 0x154   :  { %1317 = vrot.lane.b32.xlu1 %v1249_v4, %s3445_s21 }
 0x155   :  { %1331 = vrot.lane.b32.xlu0 %v1256_v13, %s3445_s21 }
 0x158   :  { %1321 = vrot.lane.b32.xlu1 %v1251_v5, %s3445_s21 }
 0x159   :  { %1335 = vrot.lane.b32.xlu0 %v1258_v15, %s3445_s21 }
 0x15c   :  { %1325 = vrot.lane.b32.xlu1 %v1253_v7, %s3445_s21 }
 0x15d   :  { %1339 = vrot.lane.b32.xlu0 %v1260_v17, %s3445_s21 }
 0x160   :  { %1329 = vrot.lane.b32.xlu1 %v1255_v12, %s3445_s21 }
 0x161   :  { %1343 = vrot.lane.b32.xlu0 %v1262_v19, %s3445_s21 }
 0x164   :  { %1333 = vrot.lane.b32.xlu1 %v1257_v14, %s3445_s21 }
 0x165   :  { %1347 = vrot.lane.b32.xlu0 %v1264_v21, %s3445_s21 }
 0x168   :  { %1337 = vrot.lane.b32.xlu1 %v1259_v16, %s3445_s21 }
 0x169   :  { %1351 = vrot.lane.b32.xlu0 %v1266_v23, %s3445_s21 }
 0x16c   :  { %1341 = vrot.lane.b32.xlu1 %v1261_v18, %s3445_s21 }
 0x16d   :  { %1355 = vrot.lane.b32.xlu0 %v1268_v25, %s3445_s21 }
 0x170   :  { %1345 = vrot.lane.b32.xlu1 %v1263_v20, %s3445_s21 }
 0x171   :  { %1359 = vrot.lane.b32.xlu0 %v1270_v27, %s3445_s21 }
 0x174   :  { %1349 = vrot.lane.b32.xlu1 %v1265_v22, %s3445_s21 }
 0x175   :  { %1363 = vrot.lane.b32.xlu0 %v1272_v29, %s3445_s21 }
 0x178   :  { %1353 = vrot.lane.b32.xlu1 %v1267_v24, %s3445_s21 }
 0x179   :  { %1367 = vrot.lane.b32.xlu0 %v1274_v31, %s3445_s21 }
 0x17c   :  { %1357 = vrot.lane.b32.xlu1 %v1269_v26, %s3445_s21 }
 0x17d   :  { %1371 = vrot.lane.b32.xlu0 %v1276_v33, %s3445_s21 }
 0x180   :  { %1361 = vrot.lane.b32.xlu1 %v1271_v28, %s3445_s21 }
 0x184   :  { %1365 = vrot.lane.b32.xlu1 %v1273_v30, %s3445_s21 }
 0x188   :  { %1369 = vrot.lane.b32.xlu1 %v1275_v32, %s3445_s21 }
 0x1ea   :  { %v3037_v34 = vpop.f32.mrb[0].mxu1 }
 0x1eb   :  { %v625_v58 = vadd.f32 %v3037_v34, %v3808_v57  ;;  %v619_v35 = vpop.f32.mrb[1].mxu1 }
 0x1ec   :  { %v620_v59 = vadd.f32 %v3808_v57, %v619_v35 }
 0x1ed   :  { %v779_v62 = vmax.f32 %v625_v58, 0.0 }
 0x1ee   :  { %v778_v60 = vmax.f32 %v620_v59, 0.0  ;;  %v3040_v61 = vpop.f32.mrb[2].mxu1 }
 0x1ef   :  { %v635_v36 = vadd.f32 %v3040_v61, %v3808_v57  ;;  %v629_v63 = vpop.f32.mrb[3].mxu1 }
 0x1f0   :  { %v630_v37 = vadd.f32 %v3808_v57, %v629_v63  ;;  %3091 = vmatprep.mubr.msk.f32.mxu0 %vm456_vm1, %v778_v60 }
 0x1f1   :  { %3092 = vmatmul.mubr.msk.f32.vlgmr.msra.gmra.mrb[32].mxu0 %vm456_vm1, %v779_v62  ;;  %v781_v3 = vmax.f32 %v635_v36, 0.0 }
 0x1f2   :  { %v780_v0 = vmax.f32 %v630_v37, 0.0  ;;  %v3043_v1 = vpop.f32.mrb[4].mxu1 }
 0x1f3   :  { %v645_v8 = vadd.f32 %v3043_v1, %v3808_v57  ;;  %v639_v9 = vpop.f32.mrb[5].mxu1 }
 0x1f4   :  { %v640_v11 = vadd.f32 %v3808_v57, %v639_v9  ;;  %3094 = vmatprep.mubr.msk.f32.mxu0 %vm456_vm1, %v780_v0 }
 0x1f5   :  { %3095 = vmatmul.mubr.msk.f32.gmra.mrb[34].mxu0 %vm456_vm1, %v781_v3  ;;  %v783_v40 = vmax.f32 %v645_v8, 0.0 }
 0x1f6   :  { %v782_v38 = vmax.f32 %v640_v11, 0.0  ;;  %v3046_v39 = vpop.f32.mrb[6].mxu1 }
 0x1f7   :  { %v655_v41 = vadd.f32 %v3046_v39, %v3808_v57  ;;  %v649_v42 = vpop.f32.mrb[7].mxu1 }
 0x1f8   :  { %v650_v43 = vadd.f32 %v3808_v57, %v649_v42  ;;  %3097 = vmatprep.mubr.msk.f32.mxu0 %vm456_vm1, %v782_v38 }
 0x1f9   :  { %3098 = vmatmul.mubr.msk.f32.gmra.mrb[36].mxu0 %vm456_vm1, %v783_v40  ;;  %v785_v46 = vmax.f32 %v655_v41, 0.0 }
 0x1fa   :  { %v784_v44 = vmax.f32 %v650_v43, 0.0  ;;  %v3049_v45 = vpop.f32.mrb[8].mxu1 }
 0x1fb   :  { %v665_v47 = vadd.f32 %v3049_v45, %v3808_v57  ;;  %v659_v49 = vpop.f32.mrb[9].mxu1 }
 0x1fc   :  { %v660_v50 = vadd.f32 %v3808_v57, %v659_v49  ;;  %3100 = vmatprep.mubr.msk.f32.mxu0 %vm456_vm1, %v784_v44 }
 0x1fd   :  { %3101 = vmatmul.mubr.msk.f32.gmra.mrb[38].mxu0 %vm456_vm1, %v785_v46  ;;  %v787_v53 = vmax.f32 %v665_v47, 0.0 }
 0x1fe   :  { %v786_v51 = vmax.f32 %v660_v50, 0.0  ;;  %v3052_v52 = vpop.f32.mrb[10].mxu1 }
 0x1ff   :  { %v675_v54 = vadd.f32 %v3052_v52, %v3808_v57  ;;  %v669_v48 = vpop.f32.mrb[11].mxu1 }
 0x200   :  { %v670_v55 = vadd.f32 %v3808_v57, %v669_v48  ;;  %3103 = vmatprep.mubr.msk.f32.mxu0 %vm456_vm1, %v786_v51 }
 0x201   :  { %3104 = vmatmul.mubr.msk.f32.gmra.mrb[40].mxu0 %vm456_vm1, %v787_v53  ;;  %v789_v5 = vmax.f32 %v675_v54, 0.0 }
 0x202   :  { %v788_v4 = vmax.f32 %v670_v55, 0.0  ;;  %v3055_v2 = vpop.f32.mrb[12].mxu1  ;;  %v1797_v55 = vld [vmem:[#allocation7 + $0x58] sm:$0xff] }
 0x203   :  { %v685_v6 = vadd.f32 %v3055_v2, %v3808_v57  ;;  %v679_v7 = vpop.f32.mrb[13].mxu1  ;;  %v1799_v2 = vld [vmem:[#allocation7 + $0x68] sm:$0xff] }
 0x204   :  { %v680_v10 = vadd.f32 %v3808_v57, %v679_v7  ;;  %3106 = vmatprep.mubr.msk.f32.mxu0 %vm456_vm1, %v788_v4  ;;  %v1798_v4 = vld [vmem:[#allocation7 + $0x60] sm:$0xff] }
 0x205   :  { %3107 = vmatmul.mubr.msk.f32.gmra.mrb[42].mxu0 %vm456_vm1, %v789_v5  ;;  %v791_v14 = vmax.f32 %v685_v6, 0.0  ;;  %v3321_v5 = vpack.c.bf16 %v1798_v4, %v1797_v55  ;;  %v1800_v6 = vld [vmem:[#allocation7 + $0x70] sm:$0xff] }
 0x206   :  { %v790_v12 = vmax.f32 %v680_v10, 0.0  ;;  %v3058_v13 = vpop.f32.mrb[14].mxu1  ;;  %v3325_v7 = vpack.c.bf16 %v1800_v6, %v1799_v2  ;;  %v1310_v10 = vpop.permute.xlu0 %1309 }
 0x207   :  { %v695_v15 = vadd.f32 %v3058_v13, %v3808_v57  ;;  %v689_v56 = vpop.f32.mrb[15].mxu1  ;;  %3322 = vmatprep.subr.bf16.mxu0 %v3321_v5 }
 0x208   :  { %v690_v16 = vadd.f32 %v3808_v57, %v689_v56  ;;  %3109 = vmatprep.mubr.msk.f32.mxu0 %vm456_vm1, %v790_v12  ;;  %3324 = vmatpush3.bf16.msra.mxu0 %v3321_v5 }
 0x209   :  { %3110 = vmatmul.mubr.msk.f32.gmra.mrb[44].mxu0 %vm456_vm1, %v791_v14  ;;  %v793_v19 = vmax.f32 %v695_v15, 0.0  ;;  %3326 = vmatprep.subr.bf16.mxu0 %v3325_v7 }
 0x20a   :  { %v792_v17 = vmax.f32 %v690_v16, 0.0  ;;  %v3061_v18 = vpop.f32.mrb[16].mxu1  ;;  %v1316_v13 = vpop.permute.xlu0 %1315 }
 0x20b   :  { %v705_v20 = vadd.f32 %v3061_v18, %v3808_v57  ;;  %v699_v21 = vpop.f32.mrb[17].mxu1 }
 0x20c   :  { %v700_v22 = vadd.f32 %v3808_v57, %v699_v21  ;;  %3112 = vmatprep.mubr.msk.f32.mxu0 %vm456_vm1, %v792_v17  ;;  %3328 = vmatpush3.bf16.msra.mxu0 %v3325_v7 }
 0x20d   :  { %3113 = vmatmul.mubr.msk.f32.gmra.mrb[46].mxu0 %vm456_vm1, %v793_v19  ;;  %v795_v25 = vmax.f32 %v705_v20, 0.0  ;;  %v3874_v19 = vld [vmem:[#allocation5 + $0x5] ss:$0 sm:$0xff] }
 0x20e   :  { %v794_v23 = vmax.f32 %v700_v22, 0.0  ;;  %v3064_v24 = vpop.f32.mrb[18].mxu1  ;;  %v1320_v15 = vpop.permute.xlu0 %1319 }
 0x20f   :  { %v715_v26 = vadd.f32 %v3064_v24, %v3808_v57  ;;  %v709_v27 = vpop.f32.mrb[19].mxu1 }
 0x210   :  { %v710_v28 = vadd.f32 %v3808_v57, %v709_v27  ;;  %3115 = vmatprep.mubr.msk.f32.mxu0 %vm456_vm1, %v794_v23 }
 0x211   :  { %3116 = vmatmul.mubr.msk.f32.gmra.mrb[48].mxu0 %vm456_vm1, %v795_v25  ;;  %v797_v31 = vmax.f32 %v715_v26, 0.0 }
 0x212   :  { %v796_v29 = vmax.f32 %v710_v28, 0.0  ;;  %v3067_v30 = vpop.f32.mrb[20].mxu1  ;;  %v1324_v16 = vpop.permute.xlu0 %1323 }
 0x213   :  { %v725_v32 = vadd.f32 %v3067_v30, %v3808_v57  ;;  %v719_v33 = vpop.f32.mrb[21].mxu1 }
 0x214   :  { %v720_v34 = vadd.f32 %v3808_v57, %v719_v33  ;;  %3118 = vmatprep.mubr.msk.f32.mxu0 %vm456_vm1, %v796_v29 }
 0x215   :  { %3119 = vmatmul.mubr.msk.f32.gmra.mrb[50].mxu0 %vm456_vm1, %v797_v31  ;;  %v799_v59 = vmax.f32 %v725_v32, 0.0 }
 0x216   :  { %v798_v58 = vmax.f32 %v720_v34, 0.0  ;;  %v3070_v35 = vpop.f32.mrb[22].mxu1  ;;  %v1328_v18 = vpop.permute.xlu0 %1327 }
 0x217   :  { %v735_v60 = vadd.f32 %v3070_v35, %v3808_v57  ;;  %v729_v61 = vpop.f32.mrb[23].mxu1 }
 0x218   :  { %v730_v62 = vadd.f32 %v3808_v57, %v729_v61  ;;  %3121 = vmatprep.mubr.msk.f32.mxu0 %vm456_vm1, %v798_v58 }
 0x219   :  { %3122 = vmatmul.mubr.msk.f32.gmra.mrb[52].mxu0 %vm456_vm1, %v799_v59  ;;  %v801_v37 = vmax.f32 %v735_v60, 0.0 }
 0x21a   :  { %v800_v36 = vmax.f32 %v730_v62, 0.0  ;;  %v3073_v63 = vpop.f32.mrb[24].mxu1  ;;  %v1332_v25 = vpop.permute.xlu0 %1331 }
 0x21b   :  { %v745_v0 = vadd.f32 %v3073_v63, %v3808_v57  ;;  %v739_v1 = vpop.f32.mrb[25].mxu1 }
 0x21c   :  { %v740_v3 = vadd.f32 %v3808_v57, %v739_v1  ;;  %3124 = vmatprep.mubr.msk.f32.mxu0 %vm456_vm1, %v800_v36 }
 0x21d   :  { %3125 = vmatmul.mubr.msk.f32.gmra.mrb[54].mxu0 %vm456_vm1, %v801_v37  ;;  %v803_v11 = vmax.f32 %v745_v0, 0.0 }
 0x21e   :  { %v802_v8 = vmax.f32 %v740_v3, 0.0  ;;  %v3076_v9 = vpop.f32.mrb[26].mxu1  ;;  %v1336_v60 = vpop.permute.xlu0 %1335 }
 0x21f   :  { %v755_v38 = vadd.f32 %v3076_v9, %v3808_v57  ;;  %v749_v39 = vpop.f32.mrb[27].mxu1 }
 0x220   :  { %v750_v40 = vadd.f32 %v3808_v57, %v749_v39  ;;  %3127 = vmatprep.mubr.msk.f32.mxu0 %vm456_vm1, %v802_v8 }
 0x221   :  { %3128 = vmatmul.mubr.msk.f32.gmra.mrb[56].mxu0 %vm456_vm1, %v803_v11  ;;  %v805_v43 = vmax.f32 %v755_v38, 0.0 }
 0x222   :  { %v804_v41 = vmax.f32 %v750_v40, 0.0  ;;  %v3079_v42 = vpop.f32.mrb[28].mxu1  ;;  %v1340_v8 = vpop.permute.xlu0 %1339 }
 0x223   :  { %v765_v44 = vadd.f32 %v3079_v42, %v3808_v57  ;;  %v759_v45 = vpop.f32.mrb[29].mxu1 }
 0x224   :  { %v760_v46 = vadd.f32 %v3808_v57, %v759_v45  ;;  %3130 = vmatprep.mubr.msk.f32.mxu0 %vm456_vm1, %v804_v41 }
 0x225   :  { %3131 = vmatmul.mubr.msk.f32.gmra.mrb[58].mxu0 %vm456_vm1, %v805_v43  ;;  %v807_v50 = vmax.f32 %v765_v44, 0.0 }
 0x226   :  { %v806_v47 = vmax.f32 %v760_v46, 0.0  ;;  %v3082_v49 = vpop.f32.mrb[30].mxu1 }
 0x227   :  { %v775_v51 = vadd.f32 %v3082_v49, %v3808_v57  ;;  %v769_v52 = vpop.f32.mrb[31].mxu1  ;;  %v1344_v49 = vpop.permute.xlu0 %1343 }
 0x228   :  { %v770_v53 = vadd.f32 %v3808_v57, %v769_v52  ;;  %3133 = vmatprep.mubr.msk.f32.mxu0 %vm456_vm1, %v806_v47  ;;  %v1312_v57 = vpop.permute.xlu1 %1311 }
 0x229   :  { %3134 = vmatmul.mubr.msk.f32.gmra.mrb[60].mxu0 %vm456_vm1, %v807_v50  ;;  %v809_v48 = vmax.f32 %v775_v51, 0.0 }
 0x22a   :  { %v808_v54 = vmax.f32 %v770_v53, 0.0 }
 0x22b   :  { %v1348_v2 = vpop.permute.xlu0 %1347 }
 0x22c   :  { %3136 = vmatprep.mubr.msk.f32.mxu0 %vm456_vm1, %v808_v54  ;;  %v1314_v12 = vpop.permute.xlu1 %1313 }
 0x22d   :  { %3137 = vmatmul.mubr.msk.f32.gmra.mrb[62].mxu0 %vm456_vm1, %v809_v48 }
 0x230   :  { %v1318_v14 = vpop.permute.xlu1 %1317 }
 0x234   :  { %v1322_v56 = vpop.permute.xlu1 %1321 }
 0x238   :  { %v1326_v17 = vpop.permute.xlu1 %1325 }
 0x23c   :  { %v1330_v24 = vpop.permute.xlu1 %1329 }
 0x240   :  { %v1334_v34 = vpop.permute.xlu1 %1333 }
 0x244   :  { %v1338_v3 = vpop.permute.xlu1 %1337 }
 0x248   :  { %v1342_v44 = vpop.permute.xlu1 %1341 }
 0x24c   :  { %v1346_v4 = vpop.permute.xlu1 %1345 }
 0x2c4   :  { %v3093_v20 = vpop.f32.mrb[32].mxu0 }
 0x2c5   :  { %v3877_v21 = vadd.f32 %v3093_v20, %v3874_v19  ;;  %v981_v22 = vpop.f32.mrb[33].mxu0 }
 0x2c6   :  { %v3880_v23 = vadd.f32 %v3874_v19, %v981_v22 }
 0x2c7   :  { %v1406_v30 = vadd.f32 %v1312_v57, %v3877_v21 }
 0x2c8   :  { %v3096_v26 = vpop.f32.mrb[34].mxu0  ;;  %v1405_v27 = vadd.f32 %v1310_v10, %v3880_v23 }
 0x2c9   :  { %v3884_v28 = vadd.f32 %v3096_v26, %v3874_v19  ;;  %v991_v29 = vpop.f32.mrb[35].mxu0 }
 0x2ca   :  { %v3888_v31 = vadd.f32 %v3874_v19, %v991_v29  ;;  %3141 = vmatprep.mubr.msk.f32.mxu1 %vm1443_vm2, %v1405_v27 }
 0x2cb   :  { %3142 = vmatmul.mubr.msk.f32.vlgmr.msra.gmra.mrb[32].mxu1 %vm1443_vm2, %v1406_v30  ;;  %v1408_v59 = vadd.f32 %v1316_v13, %v3884_v28 }
 0x2cc   :  { %v3099_v32 = vpop.f32.mrb[36].mxu0  ;;  %v1407_v33 = vadd.f32 %v1314_v12, %v3888_v31 }
 0x2cd   :  { %v3894_v58 = vadd.f32 %v3099_v32, %v3874_v19  ;;  %v1001_v35 = vpop.f32.mrb[37].mxu0 }
 0x2ce   :  { %v3898_v61 = vadd.f32 %v3874_v19, %v1001_v35  ;;  %3144 = vmatprep.mubr.msk.f32.mxu1 %vm1443_vm2, %v1407_v33 }
 0x2cf   :  { %3145 = vmatmul.mubr.msk.f32.gmra.mrb[34].mxu1 %vm1443_vm2, %v1408_v59  ;;  %v1410_v0 = vadd.f32 %v1320_v15, %v3894_v58  ;;  %v1350_v15 = vpop.permute.xlu1 %1349 }
 0x2d0   :  { %v3102_v62 = vpop.f32.mrb[38].mxu0  ;;  %v1409_v36 = vadd.f32 %v1318_v14, %v3898_v61 }
 0x2d1   :  { %v3904_v63 = vadd.f32 %v3102_v62, %v3874_v19  ;;  %v1011_v37 = vpop.f32.mrb[39].mxu0 }
 0x2d2   :  { %v3908_v1 = vadd.f32 %v3874_v19, %v1011_v37  ;;  %3147 = vmatprep.mubr.msk.f32.mxu1 %vm1443_vm2, %v1409_v36 }
 0x2d3   :  { %3148 = vmatmul.mubr.msk.f32.gmra.mrb[36].mxu1 %vm1443_vm2, %v1410_v0  ;;  %v1412_v40 = vadd.f32 %v1324_v16, %v3904_v63  ;;  %v1354_v30 = vpop.permute.xlu1 %1353 }
 0x2d4   :  { %v3105_v9 = vpop.f32.mrb[40].mxu0  ;;  %v1411_v11 = vadd.f32 %v1322_v56, %v3908_v1 }
 0x2d5   :  { %v3914_v38 = vadd.f32 %v3105_v9, %v3874_v19  ;;  %v1021_v39 = vpop.f32.mrb[41].mxu0 }
 0x2d6   :  { %v3918_v41 = vadd.f32 %v3874_v19, %v1021_v39  ;;  %3150 = vmatprep.mubr.msk.f32.mxu1 %vm1443_vm2, %v1411_v11 }
 0x2d7   :  { %3151 = vmatmul.mubr.msk.f32.gmra.mrb[38].mxu1 %vm1443_vm2, %v1412_v40  ;;  %v1414_v47 = vadd.f32 %v1328_v18, %v3914_v38  ;;  %v1352_v18 = vpop.permute.xlu0 %1351  ;;  %v1358_v0 = vpop.permute.xlu1 %1357 }
 0x2d8   :  { %v3108_v42 = vpop.f32.mrb[42].mxu0  ;;  %v1413_v43 = vadd.f32 %v1326_v17, %v3918_v41 }
 0x2d9   :  { %v3924_v45 = vadd.f32 %v3108_v42, %v3874_v19  ;;  %v1031_v46 = vpop.f32.mrb[43].mxu0 }
 0x2da   :  { %v3928_v50 = vadd.f32 %v3874_v19, %v1031_v46  ;;  %3153 = vmatprep.mubr.msk.f32.mxu1 %vm1443_vm2, %v1413_v43 }
 0x2db   :  { %3154 = vmatmul.mubr.msk.f32.gmra.mrb[40].mxu1 %vm1443_vm2, %v1414_v47  ;;  %v1416_v48 = vadd.f32 %v1332_v25, %v3924_v45  ;;  %v1356_v32 = vpop.permute.xlu0 %1355 }
 0x2dc   :  { %v3111_v51 = vpop.f32.mrb[44].mxu0  ;;  %v1415_v52 = vadd.f32 %v1330_v24, %v3928_v50 }
 0x2dd   :  { %v3934_v53 = vadd.f32 %v3111_v51, %v3874_v19  ;;  %v1041_v54 = vpop.f32.mrb[45].mxu0 }
 0x2de   :  { %v3938_v55 = vadd.f32 %v3874_v19, %v1041_v54  ;;  %3156 = vmatprep.mubr.msk.f32.mxu1 %vm1443_vm2, %v1415_v52 }
 0x2df   :  { %3157 = vmatmul.mubr.msk.f32.gmra.mrb[42].mxu1 %vm1443_vm2, %v1416_v48  ;;  %v1418_v10 = vadd.f32 %v1336_v60, %v3934_v53  ;;  %v1360_v11 = vpop.permute.xlu0 %1359 }
 0x2e0   :  { %v3114_v5 = vpop.f32.mrb[46].mxu0  ;;  %v1417_v6 = vadd.f32 %v1334_v34, %v3938_v55 }
 0x2e1   :  { %v3944_v7 = vadd.f32 %v3114_v5, %v3874_v19  ;;  %v1051_v57 = vpop.f32.mrb[47].mxu0 }
 0x2e2   :  { %v3948_v12 = vadd.f32 %v3874_v19, %v1051_v57  ;;  %3159 = vmatprep.mubr.msk.f32.mxu1 %vm1443_vm2, %v1417_v6 }
 0x2e3   :  { %3160 = vmatmul.mubr.msk.f32.gmra.mrb[44].mxu1 %vm1443_vm2, %v1418_v10  ;;  %v1420_v17 = vadd.f32 %v1340_v8, %v3944_v7  ;;  %v1364_v51 = vpop.permute.xlu0 %1363 }
 0x2e4   :  { %v3117_v13 = vpop.f32.mrb[48].mxu0  ;;  %v1419_v14 = vadd.f32 %v1338_v3, %v3948_v12 }
 0x2e5   :  { %v3954_v56 = vadd.f32 %v3117_v13, %v3874_v19  ;;  %v1061_v16 = vpop.f32.mrb[49].mxu0 }
 0x2e6   :  { %v3958_v20 = vadd.f32 %v3874_v19, %v1061_v16  ;;  %3162 = vmatprep.mubr.msk.f32.mxu1 %vm1443_vm2, %v1419_v14 }
 0x2e7   :  { %3163 = vmatmul.mubr.msk.f32.gmra.mrb[46].mxu1 %vm1443_vm2, %v1420_v17  ;;  %v1422_v27 = vadd.f32 %v1344_v49, %v3954_v56  ;;  %v1362_v49 = vpop.permute.xlu1 %1361  ;;  %v1368_v16 = vpop.permute.xlu0 %1367 }
 0x2e8   :  { %v3120_v22 = vpop.f32.mrb[50].mxu0  ;;  %v1421_v24 = vadd.f32 %v1342_v44, %v3958_v20 }
 0x2e9   :  { %v3964_v25 = vadd.f32 %v3120_v22, %v3874_v19  ;;  %v1071_v26 = vpop.f32.mrb[51].mxu0 }
 0x2ea   :  { %v3968_v29 = vadd.f32 %v3874_v19, %v1071_v26  ;;  %3165 = vmatprep.mubr.msk.f32.mxu1 %vm1443_vm2, %v1421_v24 }
 0x2eb   :  { %3166 = vmatmul.mubr.msk.f32.gmra.mrb[48].mxu1 %vm1443_vm2, %v1422_v27  ;;  %v1424_v60 = vadd.f32 %v1348_v2, %v3964_v25  ;;  %v1366_v10 = vpop.permute.xlu1 %1365 }
 0x2ec   :  { %v3123_v33 = vpop.f32.mrb[52].mxu0  ;;  %v1423_v34 = vadd.f32 %v1346_v4, %v3968_v29 }
 0x2ed   :  { %v3974_v35 = vadd.f32 %v3123_v33, %v3874_v19  ;;  %v1081_v59 = vpop.f32.mrb[53].mxu0  ;;  %v1372_v33 = vpop.permute.xlu0 %1371 }
 0x2ee   :  { %v3978_v62 = vadd.f32 %v3874_v19, %v1081_v59  ;;  %3168 = vmatprep.mubr.msk.f32.mxu1 %vm1443_vm2, %v1423_v34 }
 0x2ef   :  { %3169 = vmatmul.mubr.msk.f32.gmra.mrb[50].mxu1 %vm1443_vm2, %v1424_v60  ;;  %v1426_v9 = vadd.f32 %v1352_v18, %v3974_v35  ;;  %v2159_v60 = vld [vmem:[#allocation7 + $0x78] sm:$0xff] }
 0x2f0   :  { %v3126_v36 = vpop.f32.mrb[54].mxu0  ;;  %v1425_v37 = vadd.f32 %v1350_v15, %v3978_v62 }
 0x2f1   :  { %v3984_v3 = vadd.f32 %v3126_v36, %v3874_v19  ;;  %v1091_v8 = vpop.f32.mrb[55].mxu0  ;;  %v2160_v36 = vld [vmem:[#allocation7 + $0x80] sm:$0xff] }
 0x2f2   :  { %v3988_v39 = vadd.f32 %v3874_v19, %v1091_v8  ;;  %3171 = vmatprep.mubr.msk.f32.mxu1 %vm1443_vm2, %v1425_v37  ;;  %v2161_v37 = vld [vmem:[#allocation7 + $0x88] sm:$0xff] }
 0x2f3   :  { %3172 = vmatmul.mubr.msk.f32.gmra.mrb[52].mxu1 %vm1443_vm2, %v1426_v9  ;;  %v1428_v46 = vadd.f32 %v1356_v32, %v3984_v3  ;;  %v1370_v32 = vpop.permute.xlu1 %1369  ;;  %v4036_v9 = vld [vmem:[#allocation5 + $0x2] ss:$0 sm:$0xff] }
 0x2f4   :  { %v3129_v40 = vpop.f32.mrb[56].mxu0  ;;  %v1427_v42 = vadd.f32 %v1354_v30, %v3988_v39 }
 0x2f5   :  { %v3994_v43 = vadd.f32 %v3129_v40, %v3874_v19  ;;  %v1101_v44 = vpop.f32.mrb[57].mxu0 }
 0x2f6   :  { %v3998_v47 = vadd.f32 %v3874_v19, %v1101_v44  ;;  %3174 = vmatprep.mubr.msk.f32.mxu1 %vm1443_vm2, %v1427_v42 }
 0x2f7   :  { %3175 = vmatmul.mubr.msk.f32.gmra.mrb[54].mxu1 %vm1443_vm2, %v1428_v46  ;;  %v1430_v2 = vadd.f32 %v1360_v11, %v3994_v43 }
 0x2f8   :  { %v3132_v52 = vpop.f32.mrb[58].mxu0  ;;  %v1429_v54 = vadd.f32 %v1358_v0, %v3998_v47  ;;  %v3329_v0 = vpack.c.bf16 %v2160_v36, %v2159_v60 }
 0x2f9   :  { %v4004_v48 = vadd.f32 %v3132_v52, %v3874_v19  ;;  %v1111_v4 = vpop.f32.mrb[59].mxu0 }
 0x2fa   :  { %v4008_v5 = vadd.f32 %v3874_v19, %v1111_v4  ;;  %3177 = vmatprep.mubr.msk.f32.mxu1 %vm1443_vm2, %v1429_v54  ;;  %3330 = vmatprep.subr.bf16.mxu1 %v3329_v0 }
 0x2fb   :  { %3178 = vmatmul.mubr.msk.f32.gmra.mrb[56].mxu1 %vm1443_vm2, %v1430_v2  ;;  %v1432_v15 = vadd.f32 %v1364_v51, %v4004_v48 }
 0x2fc   :  { %v3135_v6 = vpop.f32.mrb[60].mxu0  ;;  %v1431_v57 = vadd.f32 %v1362_v49, %v4008_v5  ;;  %3332 = vmatpush3.bf16.msra.mxu1 %v3329_v0 }
 0x2fd   :  { %v4014_v13 = vadd.f32 %v3135_v6, %v3874_v19  ;;  %v1121_v14 = vpop.f32.mrb[61].mxu0 }
 0x2fe   :  { %v4018_v17 = vadd.f32 %v3874_v19, %v1121_v14  ;;  %3180 = vmatprep.mubr.msk.f32.mxu1 %vm1443_vm2, %v1431_v57 }
 0x2ff   :  { %3181 = vmatmul.mubr.msk.f32.gmra.mrb[58].mxu1 %vm1443_vm2, %v1432_v15  ;;  %v1434_v27 = vadd.f32 %v1368_v16, %v4014_v13 }
 0x300   :  { %v3138_v18 = vpop.f32.mrb[62].mxu0  ;;  %v1433_v22 = vadd.f32 %v1366_v10, %v4018_v17 }
 0x301   :  { %v4024_v24 = vadd.f32 %v3138_v18, %v3874_v19  ;;  %v1131_v26 = vpop.f32.mrb[63].mxu0 }
 0x302   :  { %v4028_v30 = vadd.f32 %v3874_v19, %v1131_v26  ;;  %3183 = vmatprep.mubr.msk.f32.mxu1 %vm1443_vm2, %v1433_v22  ;;  %v2162_v19 = vld [vmem:[#allocation7 + $0x90] sm:$0xff] }
 0x303   :  { %3184 = vmatmul.mubr.msk.f32.gmra.mrb[60].mxu1 %vm1443_vm2, %v1434_v27  ;;  %v1436_v59 = vadd.f32 %v1372_v33, %v4024_v24  ;;  %v3333_v8 = vpack.c.bf16 %v2162_v19, %v2161_v37 }
 0x304   :  { %v1435_v34 = vadd.f32 %v1370_v32, %v4028_v30 }
 0x305   :  { %3334 = vmatprep.subr.bf16.mxu1 %v3333_v8 }
 0x306   :  { %3186 = vmatprep.mubr.msk.f32.mxu1 %vm1443_vm2, %v1435_v34  ;;  %3336 = vmatpush3.bf16.msra.mxu1 %v3333_v8 }
 0x307   :  { %3187 = vmatmul.mubr.msk.f32.gmra.mrb[62].mxu1 %vm1443_vm2, %v1436_v59 }
 0x39e   :  { %v3143_v11 = vpop.f32.mrb[32].mxu1 }
 0x39f   :  { %v1612_v40 = vadd.f32 %v3143_v11, %v4036_v9  ;;  %v1606_v42 = vpop.f32.mrb[33].mxu1 }
 0x3a0   :  { %v1607_v44 = vadd.f32 %v4036_v9, %v1606_v42 }
 0x3a1   :  { %v1766_v51 = vmax.f32 %v1612_v40, 0.0 }
 0x3a2   :  { %v1765_v46 = vmax.f32 %v1607_v44, 0.0  ;;  %v3146_v49 = vpop.f32.mrb[34].mxu1 }
 0x3a3   :  { %v1622_v52 = vadd.f32 %v3146_v49, %v4036_v9  ;;  %v1616_v54 = vpop.f32.mrb[35].mxu1 }
 0x3a4   :  { %v1617_v4 = vadd.f32 %v4036_v9, %v1616_v54  ;;  %3197 = vmatprep.mubr.msk.f32.mxu0 %vm456_vm1, %v1765_v46 }
 0x3a5   :  { %3198 = vmatmul.mubr.msk.f32.vlgmr.msra.gmra.mrb[64].mxu0 %vm456_vm1, %v1766_v51  ;;  %v1768_v57 = vmax.f32 %v1622_v52, 0.0 }
 0x3a6   :  { %v1767_v2 = vmax.f32 %v1617_v4, 0.0  ;;  %v3149_v6 = vpop.f32.mrb[36].mxu1 }
 0x3a7   :  { %v1632_v10 = vadd.f32 %v3149_v6, %v4036_v9  ;;  %v1626_v14 = vpop.f32.mrb[37].mxu1 }
 0x3a8   :  { %v1627_v15 = vadd.f32 %v4036_v9, %v1626_v14  ;;  %3200 = vmatprep.mubr.msk.f32.mxu0 %vm456_vm1, %v1767_v2 }
 0x3a9   :  { %3201 = vmatmul.mubr.msk.f32.gmra.mrb[66].mxu0 %vm456_vm1, %v1768_v57  ;;  %v1770_v22 = vmax.f32 %v1632_v10, 0.0 }
 0x3aa   :  { %v1769_v16 = vmax.f32 %v1627_v15, 0.0  ;;  %v3152_v18 = vpop.f32.mrb[38].mxu1 }
 0x3ab   :  { %v1642_v26 = vadd.f32 %v3152_v18, %v4036_v9  ;;  %v1636_v27 = vpop.f32.mrb[39].mxu1 }
 0x3ac   :  { %v1637_v32 = vadd.f32 %v4036_v9, %v1636_v27  ;;  %3203 = vmatprep.mubr.msk.f32.mxu0 %vm456_vm1, %v1769_v16 }
 0x3ad   :  { %3204 = vmatmul.mubr.msk.f32.gmra.mrb[68].mxu0 %vm456_vm1, %v1770_v22  ;;  %v1772_v59 = vmax.f32 %v1642_v26, 0.0 }
 0x3ae   :  { %v1771_v33 = vmax.f32 %v1637_v32, 0.0  ;;  %v3155_v34 = vpop.f32.mrb[40].mxu1 }
 0x3af   :  { %v1652_v60 = vadd.f32 %v3155_v34, %v4036_v9  ;;  %v1646_v36 = vpop.f32.mrb[41].mxu1 }
 0x3b0   :  { %v1647_v37 = vadd.f32 %v4036_v9, %v1646_v36  ;;  %3206 = vmatprep.mubr.msk.f32.mxu0 %vm456_vm1, %v1771_v33 }
 0x3b1   :  { %3207 = vmatmul.mubr.msk.f32.gmra.mrb[70].mxu0 %vm456_vm1, %v1772_v59  ;;  %v1774_v8 = vmax.f32 %v1652_v60, 0.0 }
 0x3b2   :  { %v1773_v0 = vmax.f32 %v1647_v37, 0.0  ;;  %v3158_v19 = vpop.f32.mrb[42].mxu1 }
 0x3b3   :  { %v1662_v11 = vadd.f32 %v3158_v19, %v4036_v9  ;;  %v1656_v40 = vpop.f32.mrb[43].mxu1 }
 0x3b4   :  { %v1657_v42 = vadd.f32 %v4036_v9, %v1656_v40  ;;  %3209 = vmatprep.mubr.msk.f32.mxu0 %vm456_vm1, %v1773_v0 }
 0x3b5   :  { %3210 = vmatmul.mubr.msk.f32.gmra.mrb[72].mxu0 %vm456_vm1, %v1774_v8  ;;  %v1776_v49 = vmax.f32 %v1662_v11, 0.0 }
 0x3b6   :  { %v1775_v44 = vmax.f32 %v1657_v42, 0.0  ;;  %v3161_v46 = vpop.f32.mrb[44].mxu1 }
 0x3b7   :  { %v1672_v51 = vadd.f32 %v3161_v46, %v4036_v9  ;;  %v1666_v52 = vpop.f32.mrb[45].mxu1 }
 0x3b8   :  { %v1667_v54 = vadd.f32 %v4036_v9, %v1666_v52  ;;  %3212 = vmatprep.mubr.msk.f32.mxu0 %vm456_vm1, %v1775_v44 }
 0x3b9   :  { %3213 = vmatmul.mubr.msk.f32.gmra.mrb[74].mxu0 %vm456_vm1, %v1776_v49  ;;  %v1778_v6 = vmax.f32 %v1672_v51, 0.0 }
 0x3ba   :  { %v1777_v4 = vmax.f32 %v1667_v54, 0.0  ;;  %v3164_v2 = vpop.f32.mrb[46].mxu1 }
 0x3bb   :  { %v1682_v57 = vadd.f32 %v3164_v2, %v4036_v9  ;;  %v1676_v10 = vpop.f32.mrb[47].mxu1 }
 0x3bc   :  { %v1677_v14 = vadd.f32 %v4036_v9, %v1676_v10  ;;  %3215 = vmatprep.mubr.msk.f32.mxu0 %vm456_vm1, %v1777_v4 }
 0x3bd   :  { %3216 = vmatmul.mubr.msk.f32.gmra.mrb[76].mxu0 %vm456_vm1, %v1778_v6  ;;  %v1780_v18 = vmax.f32 %v1682_v57, 0.0 }
 0x3be   :  { %v1779_v15 = vmax.f32 %v1677_v14, 0.0  ;;  %v3167_v16 = vpop.f32.mrb[48].mxu1 }
 0x3bf   :  { %v1692_v22 = vadd.f32 %v3167_v16, %v4036_v9  ;;  %v1686_v26 = vpop.f32.mrb[49].mxu1 }
 0x3c0   :  { %v1687_v27 = vadd.f32 %v4036_v9, %v1686_v26  ;;  %3218 = vmatprep.mubr.msk.f32.mxu0 %vm456_vm1, %v1779_v15 }
 0x3c1   :  { %3219 = vmatmul.mubr.msk.f32.gmra.mrb[78].mxu0 %vm456_vm1, %v1780_v18  ;;  %v1782_v34 = vmax.f32 %v1692_v22, 0.0 }
 0x3c2   :  { %v1781_v32 = vmax.f32 %v1687_v27, 0.0  ;;  %v3170_v33 = vpop.f32.mrb[50].mxu1 }
 0x3c3   :  { %v1702_v59 = vadd.f32 %v3170_v33, %v4036_v9  ;;  %v1696_v60 = vpop.f32.mrb[51].mxu1 }
 0x3c4   :  { %v1697_v36 = vadd.f32 %v4036_v9, %v1696_v60  ;;  %3221 = vmatprep.mubr.msk.f32.mxu0 %vm456_vm1, %v1781_v32 }
 0x3c5   :  { %3222 = vmatmul.mubr.msk.f32.gmra.mrb[80].mxu0 %vm456_vm1, %v1782_v34  ;;  %v1784_v19 = vmax.f32 %v1702_v59, 0.0 }
 0x3c6   :  { %v1783_v37 = vmax.f32 %v1697_v36, 0.0  ;;  %v3173_v0 = vpop.f32.mrb[52].mxu1 }
 0x3c7   :  { %v1712_v8 = vadd.f32 %v3173_v0, %v4036_v9  ;;  %v1706_v11 = vpop.f32.mrb[53].mxu1 }
 0x3c8   :  { %v1707_v40 = vadd.f32 %v4036_v9, %v1706_v11  ;;  %3224 = vmatprep.mubr.msk.f32.mxu0 %vm456_vm1, %v1783_v37 }
 0x3c9   :  { %3225 = vmatmul.mubr.msk.f32.gmra.mrb[82].mxu0 %vm456_vm1, %v1784_v19  ;;  %v1786_v46 = vmax.f32 %v1712_v8, 0.0 }
 0x3ca   :  { %v1785_v42 = vmax.f32 %v1707_v40, 0.0  ;;  %v3176_v44 = vpop.f32.mrb[54].mxu1 }
 0x3cb   :  { %v1722_v49 = vadd.f32 %v3176_v44, %v4036_v9  ;;  %v1716_v51 = vpop.f32.mrb[55].mxu1  ;;  %v4102_v44 = vld [vmem:[#allocation5 + $0x3] ss:$0 sm:$0xff] }
 0x3cc   :  { %v1717_v52 = vadd.f32 %v4036_v9, %v1716_v51  ;;  %3227 = vmatprep.mubr.msk.f32.mxu0 %vm456_vm1, %v1785_v42 }
 0x3cd   :  { %3228 = vmatmul.mubr.msk.f32.gmra.mrb[84].mxu0 %vm456_vm1, %v1786_v46  ;;  %v1788_v2 = vmax.f32 %v1722_v49, 0.0 }
 0x3ce   :  { %v1787_v54 = vmax.f32 %v1717_v52, 0.0  ;;  %v3179_v4 = vpop.f32.mrb[56].mxu1 }
 0x3cf   :  { %v1732_v6 = vadd.f32 %v3179_v4, %v4036_v9  ;;  %v1726_v57 = vpop.f32.mrb[57].mxu1 }
 0x3d0   :  { %v1727_v10 = vadd.f32 %v4036_v9, %v1726_v57  ;;  %3230 = vmatprep.mubr.msk.f32.mxu0 %vm456_vm1, %v1787_v54 }
 0x3d1   :  { %3231 = vmatmul.mubr.msk.f32.gmra.mrb[86].mxu0 %vm456_vm1, %v1788_v2  ;;  %v1790_v16 = vmax.f32 %v1732_v6, 0.0 }
 0x3d2   :  { %v1789_v14 = vmax.f32 %v1727_v10, 0.0  ;;  %v3182_v15 = vpop.f32.mrb[58].mxu1 }
 0x3d3   :  { %v1742_v18 = vadd.f32 %v3182_v15, %v4036_v9  ;;  %v1736_v22 = vpop.f32.mrb[59].mxu1 }
 0x3d4   :  { %v1737_v26 = vadd.f32 %v4036_v9, %v1736_v22  ;;  %3233 = vmatprep.mubr.msk.f32.mxu0 %vm456_vm1, %v1789_v14 }
 0x3d5   :  { %3234 = vmatmul.mubr.msk.f32.gmra.mrb[88].mxu0 %vm456_vm1, %v1790_v16  ;;  %v1792_v33 = vmax.f32 %v1742_v18, 0.0 }
 0x3d6   :  { %v1791_v27 = vmax.f32 %v1737_v26, 0.0  ;;  %v3185_v32 = vpop.f32.mrb[60].mxu1 }
 0x3d7   :  { %v1752_v34 = vadd.f32 %v3185_v32, %v4036_v9  ;;  %v1746_v59 = vpop.f32.mrb[61].mxu1 }
 0x3d8   :  { %v1747_v60 = vadd.f32 %v4036_v9, %v1746_v59  ;;  %3236 = vmatprep.mubr.msk.f32.mxu0 %vm456_vm1, %v1791_v27 }
 0x3d9   :  { %3237 = vmatmul.mubr.msk.f32.gmra.mrb[90].mxu0 %vm456_vm1, %v1792_v33  ;;  %v1794_v0 = vmax.f32 %v1752_v34, 0.0 }
 0x3da   :  { %v1793_v36 = vmax.f32 %v1747_v60, 0.0  ;;  %v3188_v37 = vpop.f32.mrb[62].mxu1 }
 0x3db   :  { %v1762_v19 = vadd.f32 %v3188_v37, %v4036_v9  ;;  %v1756_v8 = vpop.f32.mrb[63].mxu1 }
 0x3dc   :  { %v1757_v11 = vadd.f32 %v4036_v9, %v1756_v8  ;;  %3239 = vmatprep.mubr.msk.f32.mxu0 %vm456_vm1, %v1793_v36 }
 0x3dd   :  { %3240 = vmatmul.mubr.msk.f32.gmra.mrb[92].mxu0 %vm456_vm1, %v1794_v0  ;;  %v1796_v42 = vmax.f32 %v1762_v19, 0.0 }
 0x3de   :  { %v1795_v40 = vmax.f32 %v1757_v11, 0.0 }
 0x3e0   :  { %3242 = vmatprep.mubr.msk.f32.mxu0 %vm456_vm1, %v1795_v40 }
 0x3e1   :  { %3243 = vmatmul.mubr.msk.f32.gmra.mrb[94].mxu0 %vm456_vm1, %v1796_v42 }
 0x478   :  { %v3199_v46 = vpop.f32.mrb[64].mxu0 }
 0x479   :  { %v1974_v49 = vadd.f32 %v3199_v46, %v4102_v44  ;;  %v1968_v51 = vpop.f32.mrb[65].mxu0 }
 0x47a   :  { %v1969_v52 = vadd.f32 %v4102_v44, %v1968_v51 }
 0x47b   :  { %v2128_v4 = vmax.f32 %v1974_v49, 0.0 }
 0x47c   :  { %v2127_v54 = vmax.f32 %v1969_v52, 0.0  ;;  %v3202_v9 = vpop.f32.mrb[66].mxu0 }
 0x47d   :  { %v1984_v2 = vadd.f32 %v3202_v9, %v4102_v44  ;;  %v1978_v6 = vpop.f32.mrb[67].mxu0 }
 0x47e   :  { %v1979_v57 = vadd.f32 %v4102_v44, %v1978_v6  ;;  %3253 = vmatprep.mubr.msk.f32.mxu1 %vm456_vm1, %v2127_v54 }
 0x47f   :  { %3254 = vmatmul.mubr.msk.f32.vlgmr.msra.gmra.mrb[64].mxu1 %vm456_vm1, %v2128_v4  ;;  %v2130_v15 = vmax.f32 %v1984_v2, 0.0 }
 0x480   :  { %v2129_v10 = vmax.f32 %v1979_v57, 0.0  ;;  %v3205_v14 = vpop.f32.mrb[68].mxu0 }
 0x481   :  { %v1994_v16 = vadd.f32 %v3205_v14, %v4102_v44  ;;  %v1988_v18 = vpop.f32.mrb[69].mxu0 }
 0x482   :  { %v1989_v22 = vadd.f32 %v4102_v44, %v1988_v18  ;;  %3256 = vmatprep.mubr.msk.f32.mxu1 %vm456_vm1, %v2129_v10 }
 0x483   :  { %3257 = vmatmul.mubr.msk.f32.gmra.mrb[66].mxu1 %vm456_vm1, %v2130_v15  ;;  %v2132_v32 = vmax.f32 %v1994_v16, 0.0 }
 0x484   :  { %v2131_v26 = vmax.f32 %v1989_v22, 0.0  ;;  %v3208_v27 = vpop.f32.mrb[70].mxu0 }
 0x485   :  { %v2004_v33 = vadd.f32 %v3208_v27, %v4102_v44  ;;  %v1998_v34 = vpop.f32.mrb[71].mxu0 }
 0x486   :  { %v1999_v59 = vadd.f32 %v4102_v44, %v1998_v34  ;;  %3259 = vmatprep.mubr.msk.f32.mxu1 %vm456_vm1, %v2131_v26 }
 0x487   :  { %3260 = vmatmul.mubr.msk.f32.gmra.mrb[68].mxu1 %vm456_vm1, %v2132_v32  ;;  %v2134_v37 = vmax.f32 %v2004_v33, 0.0 }
 0x488   :  { %v2133_v60 = vmax.f32 %v1999_v59, 0.0  ;;  %v3211_v36 = vpop.f32.mrb[72].mxu0 }
 0x489   :  { %v2014_v0 = vadd.f32 %v3211_v36, %v4102_v44  ;;  %v2008_v19 = vpop.f32.mrb[73].mxu0 }
 0x48a   :  { %v2009_v8 = vadd.f32 %v4102_v44, %v2008_v19  ;;  %3262 = vmatprep.mubr.msk.f32.mxu1 %vm456_vm1, %v2133_v60 }
 0x48b   :  { %3263 = vmatmul.mubr.msk.f32.gmra.mrb[70].mxu1 %vm456_vm1, %v2134_v37  ;;  %v2136_v42 = vmax.f32 %v2014_v0, 0.0 }
 0x48c   :  { %v2135_v11 = vmax.f32 %v2009_v8, 0.0  ;;  %v3214_v40 = vpop.f32.mrb[74].mxu0 }
 0x48d   :  { %v2024_v46 = vadd.f32 %v3214_v40, %v4102_v44  ;;  %v2018_v49 = vpop.f32.mrb[75].mxu0 }
 0x48e   :  { %v2019_v51 = vadd.f32 %v4102_v44, %v2018_v49  ;;  %3265 = vmatprep.mubr.msk.f32.mxu1 %vm456_vm1, %v2135_v11 }
 0x48f   :  { %3266 = vmatmul.mubr.msk.f32.gmra.mrb[72].mxu1 %vm456_vm1, %v2136_v42  ;;  %v2138_v9 = vmax.f32 %v2024_v46, 0.0 }
 0x490   :  { %v2137_v52 = vmax.f32 %v2019_v51, 0.0  ;;  %v3217_v54 = vpop.f32.mrb[76].mxu0 }
 0x491   :  { %v2034_v4 = vadd.f32 %v3217_v54, %v4102_v44  ;;  %v2028_v2 = vpop.f32.mrb[77].mxu0 }
 0x492   :  { %v2029_v6 = vadd.f32 %v4102_v44, %v2028_v2  ;;  %3268 = vmatprep.mubr.msk.f32.mxu1 %vm456_vm1, %v2137_v52 }
 0x493   :  { %3269 = vmatmul.mubr.msk.f32.gmra.mrb[74].mxu1 %vm456_vm1, %v2138_v9  ;;  %v2140_v14 = vmax.f32 %v2034_v4, 0.0 }
 0x494   :  { %v2139_v57 = vmax.f32 %v2029_v6, 0.0  ;;  %v3220_v10 = vpop.f32.mrb[78].mxu0 }
 0x495   :  { %v2044_v15 = vadd.f32 %v3220_v10, %v4102_v44  ;;  %v2038_v16 = vpop.f32.mrb[79].mxu0 }
 0x496   :  { %v2039_v18 = vadd.f32 %v4102_v44, %v2038_v16  ;;  %3271 = vmatprep.mubr.msk.f32.mxu1 %vm456_vm1, %v2139_v57 }
 0x497   :  { %3272 = vmatmul.mubr.msk.f32.gmra.mrb[76].mxu1 %vm456_vm1, %v2140_v14  ;;  %v2142_v27 = vmax.f32 %v2044_v15, 0.0 }
 0x498   :  { %v2141_v22 = vmax.f32 %v2039_v18, 0.0  ;;  %v3223_v26 = vpop.f32.mrb[80].mxu0 }
 0x499   :  { %v2054_v32 = vadd.f32 %v3223_v26, %v4102_v44  ;;  %v2048_v33 = vpop.f32.mrb[81].mxu0 }
 0x49a   :  { %v2049_v34 = vadd.f32 %v4102_v44, %v2048_v33  ;;  %3274 = vmatprep.mubr.msk.f32.mxu1 %vm456_vm1, %v2141_v22 }
 0x49b   :  { %3275 = vmatmul.mubr.msk.f32.gmra.mrb[78].mxu1 %vm456_vm1, %v2142_v27  ;;  %v2144_v36 = vmax.f32 %v2054_v32, 0.0 }
 0x49c   :  { %v2143_v59 = vmax.f32 %v2049_v34, 0.0  ;;  %v3226_v60 = vpop.f32.mrb[82].mxu0 }
 0x49d   :  { %v2064_v37 = vadd.f32 %v3226_v60, %v4102_v44  ;;  %v2058_v0 = vpop.f32.mrb[83].mxu0 }
 0x49e   :  { %v2059_v19 = vadd.f32 %v4102_v44, %v2058_v0  ;;  %3277 = vmatprep.mubr.msk.f32.mxu1 %vm456_vm1, %v2143_v59 }
 0x49f   :  { %3278 = vmatmul.mubr.msk.f32.gmra.mrb[80].mxu1 %vm456_vm1, %v2144_v36  ;;  %v2146_v40 = vmax.f32 %v2064_v37, 0.0 }
 0x4a0   :  { %v2145_v8 = vmax.f32 %v2059_v19, 0.0  ;;  %v3229_v11 = vpop.f32.mrb[84].mxu0 }
 0x4a1   :  { %v2074_v42 = vadd.f32 %v3229_v11, %v4102_v44  ;;  %v2068_v46 = vpop.f32.mrb[85].mxu0 }
 0x4a2   :  { %v2069_v49 = vadd.f32 %v4102_v44, %v2068_v46  ;;  %3280 = vmatprep.mubr.msk.f32.mxu1 %vm456_vm1, %v2145_v8 }
 0x4a3   :  { %3281 = vmatmul.mubr.msk.f32.gmra.mrb[82].mxu1 %vm456_vm1, %v2146_v40  ;;  %v2148_v54 = vmax.f32 %v2074_v42, 0.0 }
 0x4a4   :  { %v2147_v51 = vmax.f32 %v2069_v49, 0.0  ;;  %v3232_v52 = vpop.f32.mrb[86].mxu0 }
 0x4a5   :  { %v2084_v9 = vadd.f32 %v3232_v52, %v4102_v44  ;;  %v2078_v4 = vpop.f32.mrb[87].mxu0 }
 0x4a6   :  { %v2079_v2 = vadd.f32 %v4102_v44, %v2078_v4  ;;  %3283 = vmatprep.mubr.msk.f32.mxu1 %vm456_vm1, %v2147_v51 }
 0x4a7   :  { %3284 = vmatmul.mubr.msk.f32.gmra.mrb[84].mxu1 %vm456_vm1, %v2148_v54  ;;  %v2150_v10 = vmax.f32 %v2084_v9, 0.0 }
 0x4a8   :  { %v2149_v6 = vmax.f32 %v2079_v2, 0.0  ;;  %v3235_v57 = vpop.f32.mrb[88].mxu0 }
 0x4a9   :  { %v2094_v14 = vadd.f32 %v3235_v57, %v4102_v44  ;;  %v2088_v15 = vpop.f32.mrb[89].mxu0 }
 0x4aa   :  { %v2089_v16 = vadd.f32 %v4102_v44, %v2088_v15  ;;  %3286 = vmatprep.mubr.msk.f32.mxu1 %vm456_vm1, %v2149_v6 }
 0x4ab   :  { %3287 = vmatmul.mubr.msk.f32.gmra.mrb[86].mxu1 %vm456_vm1, %v2150_v10  ;;  %v2152_v26 = vmax.f32 %v2094_v14, 0.0 }
 0x4ac   :  { %v2151_v18 = vmax.f32 %v2089_v16, 0.0  ;;  %v3238_v22 = vpop.f32.mrb[90].mxu0 }
 0x4ad   :  { %v2104_v27 = vadd.f32 %v3238_v22, %v4102_v44  ;;  %v2098_v32 = vpop.f32.mrb[91].mxu0 }
 0x4ae   :  { %v2099_v33 = vadd.f32 %v4102_v44, %v2098_v32  ;;  %3289 = vmatprep.mubr.msk.f32.mxu1 %vm456_vm1, %v2151_v18 }
 0x4af   :  { %3290 = vmatmul.mubr.msk.f32.gmra.mrb[88].mxu1 %vm456_vm1, %v2152_v26  ;;  %v2154_v60 = vmax.f32 %v2104_v27, 0.0 }
 0x4b0   :  { %v2153_v34 = vmax.f32 %v2099_v33, 0.0  ;;  %v3241_v59 = vpop.f32.mrb[92].mxu0 }
 0x4b1   :  { %v2114_v36 = vadd.f32 %v3241_v59, %v4102_v44  ;;  %v2108_v37 = vpop.f32.mrb[93].mxu0 }
 0x4b2   :  { %v2109_v0 = vadd.f32 %v4102_v44, %v2108_v37  ;;  %3292 = vmatprep.mubr.msk.f32.mxu1 %vm456_vm1, %v2153_v34 }
 0x4b3   :  { %3293 = vmatmul.mubr.msk.f32.gmra.mrb[90].mxu1 %vm456_vm1, %v2154_v60  ;;  %v2156_v11 = vmax.f32 %v2114_v36, 0.0 }
 0x4b4   :  { %v2155_v19 = vmax.f32 %v2109_v0, 0.0  ;;  %v3244_v8 = vpop.f32.mrb[94].mxu0 }
 0x4b5   :  { %v2124_v40 = vadd.f32 %v3244_v8, %v4102_v44  ;;  %v2118_v42 = vpop.f32.mrb[95].mxu0 }
 0x4b6   :  { %v2119_v46 = vadd.f32 %v4102_v44, %v2118_v42  ;;  %3295 = vmatprep.mubr.msk.f32.mxu1 %vm456_vm1, %v2155_v19 }
 0x4b7   :  { %3296 = vmatmul.mubr.msk.f32.gmra.mrb[92].mxu1 %vm456_vm1, %v2156_v11  ;;  %v2158_v51 = vmax.f32 %v2124_v40, 0.0 }
 0x4b8   :  { %v2157_v49 = vmax.f32 %v2119_v46, 0.0 }
 0x4ba   :  { %3298 = vmatprep.mubr.msk.f32.mxu1 %vm456_vm1, %v2157_v49 }
 0x4bb   :  { %3299 = vmatmul.mubr.msk.f32.gmra.mrb[94].mxu1 %vm456_vm1, %v2158_v51 }
 0x552   :  { %v3255_v52 = vpop.f32.mrb[64].mxu1 }
 0x553   :  { %v2485_v54 = vadd.f32 %v3255_v52, %v3877_v21  ;;  %v2325_v9 = vpop.f32.mrb[65].mxu1 }
 0x554   :  { %v2484_v4 = vadd.f32 %v2325_v9, %v3880_v23 }
 0x555   :  { %2517 = vst [vmem:[#allocation8 + $0x8] sm:$0xff] %v2485_v54 }
 0x556   :  { %2516 = vst [vmem:[#allocation8] sm:$0xff] %v2484_v4  ;;  %v3258_v2 = vpop.f32.mrb[66].mxu1 }
 0x557   :  { %v2487_v44 = vadd.f32 %v3258_v2, %v3884_v28  ;;  %v2335_v6 = vpop.f32.mrb[67].mxu1 }
 0x558   :  { %v2486_v57 = vadd.f32 %v2335_v6, %v3888_v31 }
 0x559   :  { %2519 = vst [vmem:[#allocation8 + $0x18] sm:$0xff] %v2487_v44 }
 0x55a   :  { %2518 = vst [vmem:[#allocation8 + $0x10] sm:$0xff] %v2486_v57  ;;  %v3261_v10 = vpop.f32.mrb[68].mxu1 }
 0x55b   :  { %v2489_v14 = vadd.f32 %v3261_v10, %v3894_v58  ;;  %v2345_v15 = vpop.f32.mrb[69].mxu1 }
 0x55c   :  { %v2488_v16 = vadd.f32 %v2345_v15, %v3898_v61 }
 0x55d   :  { %2521 = vst [vmem:[#allocation8 + $0x28] sm:$0xff] %v2489_v14 }
 0x55e   :  { %2520 = vst [vmem:[#allocation8 + $0x20] sm:$0xff] %v2488_v16  ;;  %v3264_v21 = vpop.f32.mrb[70].mxu1 }
 0x55f   :  { %v2491_v23 = vadd.f32 %v3264_v21, %v3904_v63  ;;  %v2355_v18 = vpop.f32.mrb[71].mxu1 }
 0x560   :  { %v2490_v22 = vadd.f32 %v2355_v18, %v3908_v1 }
 0x561   :  { %2523 = vst [vmem:[#allocation8 + $0x38] sm:$0xff] %v2491_v23 }
 0x562   :  { %2522 = vst [vmem:[#allocation8 + $0x30] sm:$0xff] %v2490_v22  ;;  %v3267_v28 = vpop.f32.mrb[72].mxu1 }
 0x563   :  { %v2493_v31 = vadd.f32 %v3267_v28, %v3914_v38  ;;  %v2365_v26 = vpop.f32.mrb[73].mxu1 }
 0x564   :  { %v2492_v27 = vadd.f32 %v2365_v26, %v3918_v41 }
 0x565   :  { %2525 = vst [vmem:[#allocation8 + $0x48] sm:$0xff] %v2493_v31 }
 0x566   :  { %2524 = vst [vmem:[#allocation8 + $0x40] sm:$0xff] %v2492_v27  ;;  %v3270_v58 = vpop.f32.mrb[74].mxu1 }
 0x567   :  { %v2495_v61 = vadd.f32 %v3270_v58, %v3924_v45  ;;  %v2375_v32 = vpop.f32.mrb[75].mxu1 }
 0x568   :  { %v2494_v33 = vadd.f32 %v2375_v32, %v3928_v50 }
 0x569   :  { %2527 = vst [vmem:[#allocation8 + $0x58] sm:$0xff] %v2495_v61 }
 0x56a   :  { %2526 = vst [vmem:[#allocation8 + $0x50] sm:$0xff] %v2494_v33  ;;  %v3273_v63 = vpop.f32.mrb[76].mxu1 }
 0x56b   :  { %v2497_v1 = vadd.f32 %v3273_v63, %v3934_v53  ;;  %v2385_v34 = vpop.f32.mrb[77].mxu1 }
 0x56c   :  { %v2496_v59 = vadd.f32 %v2385_v34, %v3938_v55 }
 0x56d   :  { %2529 = vst [vmem:[#allocation8 + $0x68] sm:$0xff] %v2497_v1 }
 0x56e   :  { %2528 = vst [vmem:[#allocation8 + $0x60] sm:$0xff] %v2496_v59  ;;  %v3276_v38 = vpop.f32.mrb[78].mxu1 }
 0x56f   :  { %v2499_v41 = vadd.f32 %v3276_v38, %v3944_v7  ;;  %v2395_v60 = vpop.f32.mrb[79].mxu1 }
 0x570   :  { %v2498_v36 = vadd.f32 %v2395_v60, %v3948_v12 }
 0x571   :  { %2531 = vst [vmem:[#allocation8 + $0x78] sm:$0xff] %v2499_v41 }
 0x572   :  { %2530 = vst [vmem:[#allocation8 + $0x70] sm:$0xff] %v2498_v36  ;;  %v3279_v45 = vpop.f32.mrb[80].mxu1 }
 0x573   :  { %v2501_v50 = vadd.f32 %v3279_v45, %v3954_v56  ;;  %v2405_v37 = vpop.f32.mrb[81].mxu1 }
 0x574   :  { %v2500_v0 = vadd.f32 %v2405_v37, %v3958_v20 }
 0x575   :  { %2533 = vst [vmem:[#allocation8 + $0x88] sm:$0xff] %v2501_v50 }
 0x576   :  { %2532 = vst [vmem:[#allocation8 + $0x80] sm:$0xff] %v2500_v0  ;;  %v3282_v53 = vpop.f32.mrb[82].mxu1 }
 0x577   :  { %v2503_v55 = vadd.f32 %v3282_v53, %v3964_v25  ;;  %v2415_v19 = vpop.f32.mrb[83].mxu1 }
 0x578   :  { %v2502_v8 = vadd.f32 %v2415_v19, %v3968_v29 }
 0x579   :  { %2535 = vst [vmem:[#allocation8 + $0x98] sm:$0xff] %v2503_v55 }
 0x57a   :  { %2534 = vst [vmem:[#allocation8 + $0x90] sm:$0xff] %v2502_v8  ;;  %v3285_v7 = vpop.f32.mrb[84].mxu1 }
 0x57b   :  { %v2505_v12 = vadd.f32 %v3285_v7, %v3974_v35  ;;  %v2425_v11 = vpop.f32.mrb[85].mxu1 }
 0x57c   :  { %v2504_v40 = vadd.f32 %v2425_v11, %v3978_v62 }
 0x57d   :  { %2537 = vst [vmem:[#allocation8 + $0xa8] sm:$0xff] %v2505_v12 }
 0x57e   :  { %2536 = vst [vmem:[#allocation8 + $0xa0] sm:$0xff] %v2504_v40  ;;  %v3288_v56 = vpop.f32.mrb[86].mxu1 }
 0x57f   :  { %v2507_v20 = vadd.f32 %v3288_v56, %v3984_v3  ;;  %v2435_v42 = vpop.f32.mrb[87].mxu1 }
 0x580   :  { %v2506_v46 = vadd.f32 %v2435_v42, %v3988_v39 }
 0x581   :  { %2539 = vst [vmem:[#allocation8 + $0xb8] sm:$0xff] %v2507_v20 }
 0x582   :  { %2538 = vst [vmem:[#allocation8 + $0xb0] sm:$0xff] %v2506_v46  ;;  %v3291_v25 = vpop.f32.mrb[88].mxu1 }
 0x583   :  { %v2509_v29 = vadd.f32 %v3291_v25, %v3994_v43  ;;  %v2445_v49 = vpop.f32.mrb[89].mxu1 }
 0x584   :  { %v2508_v51 = vadd.f32 %v2445_v49, %v3998_v47 }
 0x585   :  { %2541 = vst [vmem:[#allocation8 + $0xc8] sm:$0xff] %v2509_v29 }
 0x586   :  { %2540 = vst [vmem:[#allocation8 + $0xc0] sm:$0xff] %v2508_v51  ;;  %v3294_v35 = vpop.f32.mrb[90].mxu1 }
 0x587   :  { %v2511_v62 = vadd.f32 %v3294_v35, %v4004_v48  ;;  %v2455_v52 = vpop.f32.mrb[91].mxu1 }
 0x588   :  { %v2510_v54 = vadd.f32 %v2455_v52, %v4008_v5 }
 0x589   :  { %2543 = vst [vmem:[#allocation8 + $0xd8] sm:$0xff] %v2511_v62 }
 0x58a   :  { %2542 = vst [vmem:[#allocation8 + $0xd0] sm:$0xff] %v2510_v54  ;;  %v3297_v3 = vpop.f32.mrb[92].mxu1 }
 0x58b   :  { %v2513_v39 = vadd.f32 %v3297_v3, %v4014_v13  ;;  %v2465_v9 = vpop.f32.mrb[93].mxu1 }
 0x58c   :  { %v2512_v4 = vadd.f32 %v2465_v9, %v4018_v17 }
 0x58d   :  { %2545 = vst [vmem:[#allocation8 + $0xe8] sm:$0xff] %v2513_v39 }
 0x58e   :  { %2544 = vst [vmem:[#allocation8 + $0xe0] sm:$0xff] %v2512_v4  ;;  %v3300_v43 = vpop.f32.mrb[94].mxu1 }
 0x58f   :  { %v2515_v47 = vadd.f32 %v3300_v43, %v4024_v24  ;;  %v2475_v2 = vpop.f32.mrb[95].mxu1 }
 0x590   :  { %v2514_v48 = vadd.f32 %v2475_v2, %v4028_v30 }
 0x591   :  { %2547 = vst [vmem:[#allocation8 + $0xf8] sm:$0xff] %v2515_v47 }
 0x592   :  { %2546 = vst [vmem:[#allocation8 + $0xf0] sm:$0xff] %v2514_v48 }
 0x593   :  { %3422 = shalt.err (!%p3419_p0)
}
 0x594   :  { %s3423_s27 = scalar_lea.hbm %s4218_s3, 4096 }
 0x595   :  { %p3424_p1 = scmp.ne.s32.totalorder %s4218_s3, %s3423_s27  ;;  %p3427_p2 = scmp.lt.u32.totalorder %s3423_s27, %s4218_s3 }
 0x597   :  { %p3429_p3 = pnand %p3427_p2, %p3424_p1 }
 0x599   :  { %3432 = shalt.err (!%p3429_p3)
}
 0x59a   :  { %2559 = dma.vmem_to_hbm [thread:$0]  %s2554_s23, 4096, %s4218_s3, [#allocation4], %s3441_s1, %s3441_s1, %s3442_s7  }
 0x59b   :  { %3437 = dma.done.wait [#allocation4], 4096  }
 0x59c   :  { %3438 = vsyncadd [#allocation4], 4294963200 }
 0x59d   :  { %2563 = vsyncpa [#allocation3], 1 }
 0x59e   :  { %2564 = vsyncpa [#allocation6], 1 }
 0x59f   :  { %2565 = vsyncpa [#allocation4], 1 }

</bundles_post_ra>
